<compile_context>
chip_gen: v6e
topology: v6e:2x2x1
jax: 0.10.0
libtpu: 0.0.40
codegen_flags: <defaults>
</compile_context>

<pallas_src>
import functools

import jax
import jax.numpy as jnp
from jax import lax
from jax.experimental import pallas as pl
from jax.experimental.pallas import tpu as pltpu


# ----------------------------- Pallas kernels ------------------------------

def _dense_kernel(x_ref, w_ref, b_ref, o_ref):
    """y = x @ W + b  (W pre-transposed to (K, N), b is (1, N))."""
    o_ref[...] = (jnp.dot(x_ref[...], w_ref[...], preferred_element_type=jnp.float32)
                  + b_ref[...]).astype(o_ref.dtype)


def _dense2_kernel(xa_ref, xb_ref, wa_ref, wb_ref, b_ref, o_ref):
    """y = xa @ Wa + xb @ Wb + b  — split-input dense (avoids concat(xa, xb))."""
    o_ref[...] = (jnp.dot(xa_ref[...], wa_ref[...], preferred_element_type=jnp.float32)
                  + jnp.dot(xb_ref[...], wb_ref[...], preferred_element_type=jnp.float32)
                  + b_ref[...]).astype(o_ref.dtype)


def _dense_residual_kernel(x_ref, w_ref, b_ref, res_ref, o_ref):
    """y = res + x @ W + b  — out-projection fused with the residual add."""
    o_ref[...] = (res_ref[...]
                  + jnp.dot(x_ref[...], w_ref[...], preferred_element_type=jnp.float32)
                  + b_ref[...]).astype(o_ref.dtype)


def _gru_rec_kernel(gx_ref, whh_ref, bhn_ref, out_ref, hfin_ref, h_scr):
    """GRU recurrence for one (direction, time-chunk) grid step.

    gx_ref:   (tc, B, 3H)  precomputed x @ W_ih + (b_ih + [b_hr, b_hz, 0])
    whh_ref:  (H, 3H)      fused hidden->hidden weights, gate columns [r | z | n]
    bhn_ref:  (1, H)       b_hn (cannot be folded: sits inside r * (.))
    out_ref:  (tc, B, H)   per-timestep hidden states of this chunk
    hfin_ref: (B, H)       final hidden state of this direction (resident across chunks)
    h_scr:    (B, H)       VMEM scratch carrying h across time chunks
    """
    tc, B, H3 = gx_ref.shape
    H = H3 // 3
    d = pl.program_id(0)          # 0 = forward, 1 = backward (time reversed)

    @pl.when(pl.program_id(1) == 0)
    def _init():
        h_scr[...] = jnp.zeros_like(h_scr)

    # Hoist loop-invariant loads / broadcasts out of the time loop.
    whh = whh_ref[...]                                   # (H, 3H)
    bhn = jnp.broadcast_to(bhn_ref[...], (B, H))         # (B, H)

    def step(s, h):
        # forward walks the chunk left->right, backward right->left
        t = (1 - d) * s + d * (tc - 1 - s)
        gx = gx_ref[t]                                                   # (B, 3H)
        gh = jnp.dot(h, whh, preferred_element_type=jnp.float32)         # (B, 3H) fused
        r = jax.nn.sigmoid(gx[:, :H] + gh[:, :H])
        z = jax.nn.sigmoid(gx[:, H:2 * H] + gh[:, H:2 * H])
        n = jnp.tanh(gx[:, 2 * H:] + r * (gh[:, 2 * H:] + bhn))
        h_new = n + z * (h - n)                       # == (1-z)*n + z*h
        out_ref[t] = h_new
        return h_new

    h_last = lax.fori_loop(0, tc, step, h_scr[...], unroll=min(tc, 8))
    h_scr[...] = h_last
    hfin_ref[...] = h_last        # block is resident; final chunk's value is written back


def _attn_core_kernel(q_ref, k_ref, v_ref, o_ref, *, scale):
    """softmax(q k^T * scale) v for one batch element, all heads batched."""
    q = q_ref[...]                                       # (nh, T, hd)
    k = k_ref[...]
    v = v_ref[...]
    s = jnp.einsum('hqd,hkd->hqk', q, k,
                   preferred_element_type=jnp.float32) * scale           # (nh, T, T)
    m = jnp.max(s, axis=-1, keepdims=True)
    p = jnp.exp(s - m)
    denom = jnp.sum(p, axis=-1, keepdims=True)
    attn = p * pl.reciprocal(denom, approx=True)         # EUP divide, off the VALU
    o_ref[...] = jnp.einsum('hqk,hkd->hqd', attn, v,
                            preferred_element_type=jnp.float32).astype(o_ref.dtype)


# ------------------------------- wrappers -----------------------------------

def _m_tile(M, cap=256):
    return M if M <= cap else cap


def _pick_t_chunk(T, cap=128):
    """Largest chunk size <= cap that divides T (so recurrence carries stay exact)."""
    if T <= cap:
        return T
    for c in range(cap, 0, -1):
        if T % c == 0:
            return c
    return T


def dense(x, w_t, b):
    """(M, K) @ (K, N) + (1, N), gridded over rows."""
    M, K = x.shape
    N = w_t.shape[1]
    tm = _m_tile(M)
    return pl.pallas_call(
        _dense_kernel,
        out_shape=jax.ShapeDtypeStruct((M, N), jnp.float32),
        grid=(pl.cdiv(M, tm),),
        in_specs=[pl.BlockSpec((tm, K), lambda m: (m, 0)),
                  pl.BlockSpec((K, N), lambda m: (0, 0)),
                  pl.BlockSpec((1, N), lambda m: (0, 0))],
        out_specs=pl.BlockSpec((tm, N), lambda m: (m, 0)),
        compiler_params=pltpu.CompilerParams(dimension_semantics=("parallel",)),
    )(x, w_t, b)


def dense_residual(x, w_t, b, res):
    """res + (M, K) @ (K, N) + (1, N), gridded over rows (fused residual add)."""
    M, K = x.shape
    N = w_t.shape[1]
    tm = _m_tile(M)
    return pl.pallas_call(
        _dense_residual_kernel,
        out_shape=jax.ShapeDtypeStruct((M, N), jnp.float32),
        grid=(pl.cdiv(M, tm),),
        in_specs=[pl.BlockSpec((tm, K), lambda m: (m, 0)),
                  pl.BlockSpec((K, N), lambda m: (0, 0)),
                  pl.BlockSpec((1, N), lambda m: (0, 0)),
                  pl.BlockSpec((tm, N), lambda m: (m, 0))],
        out_specs=pl.BlockSpec((tm, N), lambda m: (m, 0)),
        compiler_params=pltpu.CompilerParams(dimension_semantics=("parallel",)),
    )(x, w_t, b, res)


def gru_gate_proj_first(x2d, wih, bproj):
    """gx[d] = x2d @ wih[d] + bproj[d] for both directions.  x2d: (M, I)."""
    M, I = x2d.shape
    G = wih.shape[-1]
    tm = _m_tile(M)
    return pl.pallas_call(
        _dense_kernel,
        out_shape=jax.ShapeDtypeStruct((2, M, G), jnp.float32),
        grid=(2, pl.cdiv(M, tm)),
        in_specs=[pl.BlockSpec((tm, I), lambda d, m: (m, 0)),
                  pl.BlockSpec((None, I, G), lambda d, m: (d, 0, 0)),
                  pl.BlockSpec((None, 1, G), lambda d, m: (d, 0, 0))],
        out_specs=pl.BlockSpec((None, tm, G), lambda d, m: (d, m, 0)),
        compiler_params=pltpu.CompilerParams(
            dimension_semantics=("parallel", "parallel")),
    )(x2d, wih, bproj)


def gru_gate_proj_inner(xf2d, xb2d, wih_top, wih_bot, bproj):
    """gx[d] = xf @ wih[d][:H] + xb @ wih[d][H:] + bproj[d]  (no fwd/bwd concat)."""
    M, H = xf2d.shape
    G = wih_top.shape[-1]
    tm = _m_tile(M)
    return pl.pallas_call(
        _dense2_kernel,
        out_shape=jax.ShapeDtypeStruct((2, M, G), jnp.float32),
        grid=(2, pl.cdiv(M, tm)),
        in_specs=[pl.BlockSpec((tm, H), lambda d, m: (m, 0)),
                  pl.BlockSpec((tm, H), lambda d, m: (m, 0)),
                  pl.BlockSpec((None, H, G), lambda d, m: (d, 0, 0)),
                  pl.BlockSpec((None, H, G), lambda d, m: (d, 0, 0)),
                  pl.BlockSpec((None, 1, G), lambda d, m: (d, 0, 0))],
        out_specs=pl.BlockSpec((None, tm, G), lambda d, m: (d, m, 0)),
        compiler_params=pltpu.CompilerParams(
            dimension_semantics=("parallel", "parallel")),
    )(xf2d, xb2d, wih_top, wih_bot, bproj)


def gru_recurrence(gx, whh, bhn, *, t_chunk):
    """Both directions of one GRU layer.  gx: (2, T, B, 3H) precomputed gate inputs."""
    _, T, B, H3 = gx.shape
    H = H3 // 3
    nct = T // t_chunk

    def chunk_map(d, c):
        # backward direction consumes / produces time chunks in reverse order
        return (d, (1 - d) * c + d * (nct - 1 - c), 0, 0)

    return pl.pallas_call(
        _gru_rec_kernel,
        out_shape=(jax.ShapeDtypeStruct((2, T, B, H), jnp.float32),   # per-step states
                   jax.ShapeDtypeStruct((2, B, H), jnp.float32)),     # final states
        grid=(2, nct),
        in_specs=[pl.BlockSpec((None, t_chunk, B, H3), chunk_map),
                  pl.BlockSpec((None, H, H3), lambda d, c: (d, 0, 0)),
                  pl.BlockSpec((None, 1, H), lambda d, c: (d, 0, 0))],
        out_specs=(pl.BlockSpec((None, t_chunk, B, H), chunk_map),
                   pl.BlockSpec((None, B, H), lambda d, c: (d, 0, 0))),
        scratch_shapes=[pltpu.VMEM((B, H), jnp.float32)],
        compiler_params=pltpu.CompilerParams(
            dimension_semantics=("parallel", "arbitrary")),
    )(gx, whh, bhn)


def attention_core(q, k, v):
    """q, k, v: (B, nh, T, hd); one grid step per batch element (all heads batched)."""
    B, nh, T, hd = q.shape
    scale = 1.0 / float(hd) ** 0.5
    spec = pl.BlockSpec((None, nh, T, hd), lambda b: (b, 0, 0, 0))
    return pl.pallas_call(
        functools.partial(_attn_core_kernel, scale=scale),
        out_shape=jax.ShapeDtypeStruct((B, nh, T, hd), jnp.float32),
        grid=(B,),
        in_specs=[spec, spec, spec],
        out_specs=spec,
        compiler_params=pltpu.CompilerParams(dimension_semantics=("parallel",)),
    )(q, k, v)


# ---------------------------- encoder forward --------------------------------

def encoder_gru_forward(src, params, num_layers, hidden_dim, num_heads=4):
    H = hidden_dim
    # Embedding lookup (gather) kept as JAX glue; dropout = identity (eval mode).
    # TODO(synk): embedding gather stays as jnp.take — no clean Pallas gather win at this size.
    embedded = jnp.take(params["embedding"], src, axis=0)       # (B, T, emb)
    x = jnp.transpose(embedded, (1, 0, 2))                      # (T, B, emb)  time-major
    T, B, emb = x.shape
    M = T * B
    t_chunk = _pick_t_chunk(T)

    x2d = x.reshape(M, emb)
    out_f2d = out_b2d = None
    hidden_bwd = []
    for layer in range(num_layers):
        lp = params["gru"][layer]
        if layer == 0:
            gx2d = gru_gate_proj_first(x2d, lp["wih"], lp["bproj"])           # (2, M, 3H)
        else:
            gx2d = gru_gate_proj_inner(out_f2d, out_b2d,
                                       lp["wih_top"], lp["wih_bot"], lp["bproj"])
        gx = gx2d.reshape(2, T, B, 3 * H)                        # free (contiguous) reshape
        outs, hfin = gru_recurrence(gx, lp["whh"], lp["bhn"], t_chunk=t_chunk)
        out_f2d = outs[0].reshape(M, H)                          # free reshapes; no concat
        out_b2d = outs[1].reshape(M, H)
        hidden_bwd.append(hfin[1])
        # nn.GRU inter-layer dropout applies only in training; eval-mode identity here.

    # Single fwd/bwd concat at the very end (inner layers consumed the halves directly).
    output2d = jnp.concatenate([out_f2d, out_b2d], axis=-1)      # (M, 2H)
    E = 2 * H

    # hidden.view(L, 2, B, H)[:, -1] -> backward-direction final hidden of each layer
    hidden = jnp.stack(hidden_bwd, axis=0)                       # (L, B, H)

    # Multi-head self-attention (nn.MultiheadAttention, eval mode)
    hd = E // num_heads
    qkv = dense(output2d, params["mha"]["w_in_t"], params["mha"]["b_in"])     # (M, 3E)
    q, k, v = qkv[:, :E], qkv[:, E:2 * E], qkv[:, 2 * E:]

    def to_heads(t):
        return t.reshape(T, B, num_heads, hd).transpose(1, 2, 0, 3)           # (B, nh, T, hd)

    oh = attention_core(to_heads(q), to_heads(k), to_heads(v))                # (B, nh, T, hd)
    attn2d = oh.transpose(2, 0, 1, 3).reshape(M, E)
    # out_proj fused with the residual add: output = output + attn @ W_out + b_out
    out2d = dense_residual(attn2d, params["mha"]["w_out_t"], params["mha"]["b_out"],
                           output2d)
    output = out2d.reshape(T, B, E)
    return output, hidden


# ---------------------------- parameter setup --------------------------------

def init_params(key, input_dim, emb_dim, hidden_dim, num_layers):
    """Random params in the kernel-ready fused layout.

    Mapping from PyTorch nn.GRU (gate order r, z, n), per layer and direction:
      wih   = [W_ir^T | W_iz^T | W_in^T]                         -> (2, I, 3H)
      whh   = [W_hr^T | W_hz^T | W_hn^T]                         -> (2, H, 3H)
      bproj = [b_ir + b_hr | b_iz + b_hz | b_in]  (r/z hidden biases folded
              into the input projection; b_hn cannot be — it sits inside r*(.))
      bhn   = b_hn                                               -> (2, 1, H)
    """
    H = hidden_dim
    keys = jax.random.split(key, 3 + num_layers)

    def rnd(k, shape, scale=0.1):
        return jax.random.normal(k, shape, dtype=jnp.float32) * scale

    params = {"embedding": rnd(keys[0], (input_dim, emb_dim), 1.0), "gru": []}

    for layer in range(num_layers):
        in_dim = emb_dim if layer == 0 else 2 * H
        k = jax.random.split(keys[2 + layer], 8)
        wih_d, whh_d, bproj_d, bhn_d = [], [], [], []
        for di in range(2):                                    # 0 = fwd, 1 = bwd
            wih = rnd(k[4 * di + 0], (3, in_dim, H))           # per-gate W_ih^T (r, z, n)
            whh = rnd(k[4 * di + 1], (3, H, H))                # per-gate W_hh^T
            bih = rnd(k[4 * di + 2], (3, 1, H))
            bhh = rnd(k[4 * di + 3], (3, 1, H))
            wih_d.append(jnp.concatenate([wih[0], wih[1], wih[2]], axis=1))    # (I, 3H)
            whh_d.append(jnp.concatenate([whh[0], whh[1], whh[2]], axis=1))    # (H, 3H)
            bproj_d.append(jnp.concatenate(
                [bih[0] + bhh[0], bih[1] + bhh[1], bih[2]], axis=1))           # (1, 3H)
            bhn_d.append(bhh[2])                                               # (1, H)
        entry = {
            "wih": jnp.stack(wih_d),        # (2, I, 3H)
            "whh": jnp.stack(whh_d),        # (2, H, 3H)
            "bproj": jnp.stack(bproj_d),    # (2, 1, 3H)
            "bhn": jnp.stack(bhn_d),        # (2, 1, H)
        }
        if layer > 0:
            entry["wih_top"] = entry["wih"][:, :H, :]   # rows hit by the fwd half of x
            entry["wih_bot"] = entry["wih"][:, H:, :]   # rows hit by the bwd half of x
        params["gru"].append(entry)

    E = 2 * H
    km = jax.random.split(keys[1], 4)
    params["mha"] = {
        "w_in_t": rnd(km[0], (E, 3 * E)),    # in_proj_weight^T
        "b_in":   rnd(km[1], (1, 3 * E)),
        "w_out_t": rnd(km[2], (E, E)),       # out_proj.weight^T
        "b_out":  rnd(km[3], (1, E)),
    }
    # TODO(synk): self.fc from __init__ is never used in forward(), so it is omitted.
    return params


if __name__ == "__main__":
    input_dim, emb_dim, hidden_dim, num_layers = 50, 32, 32, 2
    batch, seq = 2, 8

    key = jax.random.PRNGKey(0)
    pkey, skey = jax.random.split(key)
    params = init_params(pkey, input_dim, emb_dim, hidden_dim, num_layers)
    src = jax.random.randint(skey, (batch, seq), 0, input_dim, dtype=jnp.int32)

    fwd = jax.jit(functools.partial(encoder_gru_forward,
                                    num_layers=num_layers,
                                    hidden_dim=hidden_dim,
                                    num_heads=4))
    output, hidden = fwd(src, params)
    jax.block_until_ready((output, hidden))

    assert output.shape == (seq, batch, 2 * hidden_dim)
    assert hidden.shape == (num_layers, batch, hidden_dim)
    assert output.dtype == jnp.float32 and hidden.dtype == jnp.float32
    print("KERNEL_OK")
</pallas_src>

<mosaic_0001>
module attributes {stable_mosaic.version = 11 : i64} {
  func.func @_dense_kernel(%arg0: i32, %arg1: i32, %arg2: memref<16x32xf32, #tpu.memory_space<vmem>>, %arg3: memref<1x32x96xf32, #tpu.memory_space<vmem>>, %arg4: memref<1x1x96xf32, #tpu.memory_space<vmem>>, %arg5: memref<1x16x96xf32, #tpu.memory_space<vmem>>) attributes {dimension_semantics = [#tpu.dimension_semantics<parallel>, #tpu.dimension_semantics<parallel>], iteration_bounds = array<i64: 2, 1>, scalar_prefetch = 0 : i64, scratch_operands = 0 : i64, tpu.core_type = #tpu.core_type<tc>, window_params = [{transform_indices = @transform_0, window_bounds = array<i64: 16, 32>}, {transform_indices = @transform_1, window_bounds = array<i64: 1, 32, 96>}, {transform_indices = @transform_2, window_bounds = array<i64: 1, 1, 96>}, {transform_indices = @transform_3, window_bounds = array<i64: 1, 16, 96>}]} {
    %c0 = arith.constant 0 : index
    %c0_0 = arith.constant 0 : index
    %0 = vector.load %arg2[%c0, %c0_0] : memref<16x32xf32, #tpu.memory_space<vmem>>, vector<16x32xf32>
    %c0_1 = arith.constant 0 : index
    %c0_2 = arith.constant 0 : index
    %c0_3 = arith.constant 0 : index
    %1 = vector.load %arg3[%c0_1, %c0_2, %c0_3] : memref<1x32x96xf32, #tpu.memory_space<vmem>>, vector<1x32x96xf32>
    %2 = vector.shape_cast %1 : vector<1x32x96xf32> to vector<32x96xf32>
    %cst = arith.constant dense<0.000000e+00> : vector<16x96xf32>
    %3 = tpu.matmul %0, %2, %cst {dimension_numbers = #tpu.dot_dimension_numbers<[1], [0], [0], [1], [0, 0, 1, 1], [], []>} : vector<16x32xf32>, vector<32x96xf32>, vector<16x96xf32> -> vector<16x96xf32>
    %c0_4 = arith.constant 0 : index
    %c0_5 = arith.constant 0 : index
    %c0_6 = arith.constant 0 : index
    %4 = vector.load %arg4[%c0_4, %c0_5, %c0_6] : memref<1x1x96xf32, #tpu.memory_space<vmem>>, vector<1x1x96xf32>
    %5 = vector.shape_cast %4 : vector<1x1x96xf32> to vector<1x96xf32>
    %6 = vector.broadcast %5 : vector<1x96xf32> to vector<16x96xf32>
    %7 = arith.addf %3, %6 : vector<16x96xf32>
    %c0_7 = arith.constant 0 : index
    %c0_8 = arith.constant 0 : index
    %c0_9 = arith.constant 0 : index
    %8 = vector.load %arg5[%c0_7, %c0_8, %c0_9] : memref<1x16x96xf32, #tpu.memory_space<vmem>>, vector<1x16x96xf32>
    %9 = vector.shape_cast %8 : vector<1x16x96xf32> to vector<16x96xf32>
    %10 = vector.shape_cast %7 : vector<16x96xf32> to vector<1x16x96xf32>
    tpu.vector_store %arg5[%c0_7, %c0_8, %c0_9], %10 {strides = array<i32>} : memref<1x16x96xf32, #tpu.memory_space<vmem>>, vector<1x16x96xf32>,
    return
  }
  func.func @transform_0(%arg0: i32, %arg1: i32) -> (i32, i32) {
    %c0_i32 = arith.constant 0 : i32
    %c0_i32_0 = arith.constant 0 : i32
    return %arg1, %c0_i32 : i32, i32
  }
  func.func @transform_1(%arg0: i32, %arg1: i32) -> (i32, i32, i32) {
    %c0_i32 = arith.constant 0 : i32
    %c0_i32_0 = arith.constant 0 : i32
    %c0_i32_1 = arith.constant 0 : i32
    return %arg0, %c0_i32, %c0_i32_0 : i32, i32, i32
  }
  func.func @transform_2(%arg0: i32, %arg1: i32) -> (i32, i32, i32) {
    %c0_i32 = arith.constant 0 : i32
    %c0_i32_0 = arith.constant 0 : i32
    %c0_i32_1 = arith.constant 0 : i32
    return %arg0, %c0_i32, %c0_i32_0 : i32, i32, i32
  }
  func.func @transform_3(%arg0: i32, %arg1: i32) -> (i32, i32, i32) {
    %c0_i32 = arith.constant 0 : i32
    %c0_i32_0 = arith.constant 0 : i32
    return %arg0, %arg1, %c0_i32 : i32, i32, i32
  }
}

module attributes {stable_mosaic.version = 11 : i64} {
  func.func @_dense2_kernel(%arg0: i32, %arg1: i32, %arg2: memref<16x32xf32, #tpu.memory_space<vmem>>, %arg3: memref<16x32xf32, #tpu.memory_space<vmem>>, %arg4: memref<1x32x96xf32, #tpu.memory_space<vmem>>, %arg5: memref<1x32x96xf32, #tpu.memory_space<vmem>>, %arg6: memref<1x1x96xf32, #tpu.memory_space<vmem>>, %arg7: memref<1x16x96xf32, #tpu.memory_space<vmem>>) attributes {dimension_semantics = [#tpu.dimension_semantics<parallel>, #tpu.dimension_semantics<parallel>], iteration_bounds = array<i64: 2, 1>, scalar_prefetch = 0 : i64, scratch_operands = 0 : i64, tpu.core_type = #tpu.core_type<tc>, window_params = [{transform_indices = @transform_0, window_bounds = array<i64: 16, 32>}, {transform_indices = @transform_1, window_bounds = array<i64: 16, 32>}, {transform_indices = @transform_2, window_bounds = array<i64: 1, 32, 96>}, {transform_indices = @transform_3, window_bounds = array<i64: 1, 32, 96>}, {transform_indices = @transform_4, window_bounds = array<i64: 1, 1, 96>}, {transform_indices = @transform_5, window_bounds = array<i64: 1, 16, 96>}]} {
    %c0 = arith.constant 0 : index
    %c0_0 = arith.constant 0 : index
    %0 = vector.load %arg2[%c0, %c0_0] : memref<16x32xf32, #tpu.memory_space<vmem>>, vector<16x32xf32>
    %c0_1 = arith.constant 0 : index
    %c0_2 = arith.constant 0 : index
    %c0_3 = arith.constant 0 : index
    %1 = vector.load %arg4[%c0_1, %c0_2, %c0_3] : memref<1x32x96xf32, #tpu.memory_space<vmem>>, vector<1x32x96xf32>
    %2 = vector.shape_cast %1 : vector<1x32x96xf32> to vector<32x96xf32>
    %cst = arith.constant dense<0.000000e+00> : vector<16x96xf32>
    %3 = tpu.matmul %0, %2, %cst {dimension_numbers = #tpu.dot_dimension_numbers<[1], [0], [0], [1], [0, 0, 1, 1], [], []>} : vector<16x32xf32>, vector<32x96xf32>, vector<16x96xf32> -> vector<16x96xf32>
    %c0_4 = arith.constant 0 : index
    %c0_5 = arith.constant 0 : index
    %4 = vector.load %arg3[%c0_4, %c0_5] : memref<16x32xf32, #tpu.memory_space<vmem>>, vector<16x32xf32>
    %c0_6 = arith.constant 0 : index
    %c0_7 = arith.constant 0 : index
    %c0_8 = arith.constant 0 : index
    %5 = vector.load %arg5[%c0_6, %c0_7, %c0_8] : memref<1x32x96xf32, #tpu.memory_space<vmem>>, vector<1x32x96xf32>
    %6 = vector.shape_cast %5 : vector<1x32x96xf32> to vector<32x96xf32>
    %cst_9 = arith.constant dense<0.000000e+00> : vector<16x96xf32>
    %7 = tpu.matmul %4, %6, %cst_9 {dimension_numbers = #tpu.dot_dimension_numbers<[1], [0], [0], [1], [0, 0, 1, 1], [], []>} : vector<16x32xf32>, vector<32x96xf32>, vector<16x96xf32> -> vector<16x96xf32>
    %8 = arith.addf %3, %7 : vector<16x96xf32>
    %c0_10 = arith.constant 0 : index
    %c0_11 = arith.constant 0 : index
    %c0_12 = arith.constant 0 : index
    %9 = vector.load %arg6[%c0_10, %c0_11, %c0_12] : memref<1x1x96xf32, #tpu.memory_space<vmem>>, vector<1x1x96xf32>
    %10 = vector.shape_cast %9 : vector<1x1x96xf32> to vector<1x96xf32>
    %11 = vector.broadcast %10 : vector<1x96xf32> to vector<16x96xf32>
    %12 = arith.addf %8, %11 : vector<16x96xf32>
    %c0_13 = arith.constant 0 : index
    %c0_14 = arith.constant 0 : index
    %c0_15 = arith.constant 0 : index
    %13 = vector.load %arg7[%c0_13, %c0_14, %c0_15] : memref<1x16x96xf32, #tpu.memory_space<vmem>>, vector<1x16x96xf32>
    %14 = vector.shape_cast %13 : vector<1x16x96xf32> to vector<16x96xf32>
    %15 = vector.shape_cast %12 : vector<16x96xf32> to vector<1x16x96xf32>
    tpu.vector_store %arg7[%c0_13, %c0_14, %c0_15], %15 {strides = array<i32>} : memref<1x16x96xf32, #tpu.memory_space<vmem>>, vector<1x16x96xf32>,
    return
  }
  func.func @transform_0(%arg0: i32, %arg1: i32) -> (i32, i32) {
    %c0_i32 = arith.constant 0 : i32
    %c0_i32_0 = arith.constant 0 : i32
    return %arg1, %c0_i32 : i32, i32
  }
  func.func @transform_1(%arg0: i32, %arg1: i32) -> (i32, i32) {
    %c0_i32 = arith.constant 0 : i32
    %c0_i32_0 = arith.constant 0 : i32
    return %arg1, %c0_i32 : i32, i32
  }
  func.func @transform_2(%arg0: i32, %arg1: i32) -> (i32, i32, i32) {
    %c0_i32 = arith.constant 0 : i32
    %c0_i32_0 = arith.constant 0 : i32
    %c0_i32_1 = arith.constant 0 : i32
    return %arg0, %c0_i32, %c0_i32_0 : i32, i32, i32
  }
  func.func @transform_3(%arg0: i32, %arg1: i32) -> (i32, i32, i32) {
    %c0_i32 = arith.constant 0 : i32
    %c0_i32_0 = arith.constant 0 : i32
    %c0_i32_1 = arith.constant 0 : i32
    return %arg0, %c0_i32, %c0_i32_0 : i32, i32, i32
  }
  func.func @transform_4(%arg0: i32, %arg1: i32) -> (i32, i32, i32) {
    %c0_i32 = arith.constant 0 : i32
    %c0_i32_0 = arith.constant 0 : i32
    %c0_i32_1 = arith.constant 0 : i32
    return %arg0, %c0_i32, %c0_i32_0 : i32, i32, i32
  }
  func.func @transform_5(%arg0: i32, %arg1: i32) -> (i32, i32, i32) {
    %c0_i32 = arith.constant 0 : i32
    %c0_i32_0 = arith.constant 0 : i32
    return %arg0, %arg1, %c0_i32 : i32, i32, i32
  }
}

module attributes {stable_mosaic.version = 11 : i64} {
  func.func @_gru_rec_kernel(%arg0: i32, %arg1: i32, %arg2: memref<1x8x2x96xf32, #tpu.memory_space<vmem>>, %arg3: memref<1x32x96xf32, #tpu.memory_space<vmem>>, %arg4: memref<1x1x32xf32, #tpu.memory_space<vmem>>, %arg5: memref<1x8x2x32xf32, #tpu.memory_space<vmem>>, %arg6: memref<1x2x32xf32, #tpu.memory_space<vmem>>, %arg7: memref<2x32xf32, #tpu.memory_space<vmem>>) attributes {dimension_semantics = [#tpu.dimension_semantics<parallel>, #tpu.dimension_semantics<arbitrary>], iteration_bounds = array<i64: 2, 1>, scalar_prefetch = 0 : i64, scratch_operands = 1 : i64, tpu.core_type = #tpu.core_type<tc>, window_params = [{transform_indices = @transform_0, window_bounds = array<i64: 1, 8, 2, 96>}, {transform_indices = @transform_1, window_bounds = array<i64: 1, 32, 96>}, {transform_indices = @transform_2, window_bounds = array<i64: 1, 1, 32>}, {transform_indices = @transform_3, window_bounds = array<i64: 1, 8, 2, 32>}, {transform_indices = @transform_4, window_bounds = array<i64: 1, 2, 32>}]} {
    %c0_i32 = arith.constant 0 : i32
    %0 = arith.cmpi eq, %arg1, %c0_i32 : i32
    %1 = arith.extui %0 : i1 to i32
    %c0_i32_0 = arith.constant 0 : i32
    %2 = arith.cmpi ne, %1, %c0_i32_0 : i32
    scf.if %2 {
      %cst_101 = arith.constant 0.000000e+00 : f32
      %318 = vector.broadcast %cst_101 : f32 to vector<2x32xf32>
      %c0_102 = arith.constant 0 : index
      %c0_103 = arith.constant 0 : index
      %319 = vector.load %arg7[%c0_102, %c0_103] : memref<2x32xf32, #tpu.memory_space<vmem>>, vector<2x32xf32>
      tpu.vector_store %arg7[%c0_102, %c0_103], %318 {strides = array<i32>} : memref<2x32xf32, #tpu.memory_space<vmem>>, vector<2x32xf32>,
    } else {
    }
    %c0 = arith.constant 0 : index
    %c0_1 = arith.constant 0 : index
    %c0_2 = arith.constant 0 : index
    %3 = vector.load %arg3[%c0, %c0_1, %c0_2] : memref<1x32x96xf32, #tpu.memory_space<vmem>>, vector<1x32x96xf32>
    %4 = vector.shape_cast %3 : vector<1x32x96xf32> to vector<32x96xf32>
    %c0_3 = arith.constant 0 : index
    %c0_4 = arith.constant 0 : index
    %c0_5 = arith.constant 0 : index
    %5 = vector.load %arg4[%c0_3, %c0_4, %c0_5] : memref<1x1x32xf32, #tpu.memory_space<vmem>>, vector<1x1x32xf32>
    %6 = vector.shape_cast %5 : vector<1x1x32xf32> to vector<1x32xf32>
    %7 = vector.shape_cast %6 : vector<1x32xf32> to vector<1x32xf32>
    %8 = vector.broadcast %7 : vector<1x32xf32> to vector<2x32xf32>
    %c0_6 = arith.constant 0 : index
    %c0_7 = arith.constant 0 : index
    %9 = vector.load %arg7[%c0_6, %c0_7] : memref<2x32xf32, #tpu.memory_space<vmem>>, vector<2x32xf32>
    %c0_i32_8 = arith.constant 0 : i32
    %c1_i32 = arith.constant 1 : i32
    %10 = arith.subi %c1_i32, %arg0 : i32
    %11 = arith.muli %10, %c0_i32_8 : i32
    %c7_i32 = arith.constant 7 : i32
    %12 = arith.subi %c7_i32, %c0_i32_8 : i32
    %13 = arith.muli %arg0, %12 : i32
    %14 = arith.addi %11, %13 : i32
    %c0_9 = arith.constant 0 : index
    %15 = arith.index_cast %14 : i32 to index
    %c0_10 = arith.constant 0 : index
    %c0_11 = arith.constant 0 : index
    %16 = vector.load %arg2[%c0_9, %15, %c0_10, %c0_11] : memref<1x8x2x96xf32, #tpu.memory_space<vmem>>, vector<1x1x2x96xf32>
    %17 = vector.shape_cast %16 : vector<1x1x2x96xf32> to vector<2x96xf32>
    %cst = arith.constant dense<0.000000e+00> : vector<2x96xf32>
    %18 = tpu.matmul %9, %4, %cst {dimension_numbers = #tpu.dot_dimension_numbers<[1], [0], [0], [1], [0, 0, 1, 1], [], []>} : vector<2x32xf32>, vector<32x96xf32>, vector<2x96xf32> -> vector<2x96xf32>
    %19 = vector.extract_strided_slice %17 {offsets = [0, 0], sizes = [2, 32], strides = [1, 1]} : vector<2x96xf32> to vector<2x32xf32>
    %20 = vector.extract_strided_slice %18 {offsets = [0, 0], sizes = [2, 32], strides = [1, 1]} : vector<2x96xf32> to vector<2x32xf32>
    %21 = arith.addf %19, %20 : vector<2x32xf32>
    %22 = arith.negf %21 : vector<2x32xf32>
    %23 = math.exp %22 : vector<2x32xf32>
    %cst_12 = arith.constant 1.000000e+00 : f32
    %24 = vector.broadcast %cst_12 : f32 to vector<2x32xf32>
    %25 = arith.addf %24, %23 : vector<2x32xf32>
    %26 = arith.divf %24, %25 : vector<2x32xf32>
    %27 = vector.extract_strided_slice %17 {offsets = [0, 32], sizes = [2, 32], strides = [1, 1]} : vector<2x96xf32> to vector<2x32xf32>
    %28 = vector.extract_strided_slice %18 {offsets = [0, 32], sizes = [2, 32], strides = [1, 1]} : vector<2x96xf32> to vector<2x32xf32>
    %29 = arith.addf %27, %28 : vector<2x32xf32>
    %30 = arith.negf %29 : vector<2x32xf32>
    %31 = math.exp %30 : vector<2x32xf32>
    %cst_13 = arith.constant 1.000000e+00 : f32
    %32 = vector.broadcast %cst_13 : f32 to vector<2x32xf32>
    %33 = arith.addf %32, %31 : vector<2x32xf32>
    %34 = arith.divf %32, %33 : vector<2x32xf32>
    %35 = vector.extract_strided_slice %17 {offsets = [0, 64], sizes = [2, 32], strides = [1, 1]} : vector<2x96xf32> to vector<2x32xf32>
    %36 = vector.extract_strided_slice %18 {offsets = [0, 64], sizes = [2, 32], strides = [1, 1]} : vector<2x96xf32> to vector<2x32xf32>
    %37 = arith.addf %36, %8 : vector<2x32xf32>
    %38 = arith.mulf %26, %37 : vector<2x32xf32>
    %39 = arith.addf %35, %38 : vector<2x32xf32>
    %40 = math.tanh %39 : vector<2x32xf32>
    %41 = arith.subf %9, %40 : vector<2x32xf32>
    %42 = arith.mulf %34, %41 : vector<2x32xf32>
    %43 = arith.addf %40, %42 : vector<2x32xf32>
    %c0_14 = arith.constant 0 : index
    %44 = arith.index_cast %14 : i32 to index
    %c0_15 = arith.constant 0 : index
    %c0_16 = arith.constant 0 : index
    %45 = vector.load %arg5[%c0_14, %44, %c0_15, %c0_16] : memref<1x8x2x32xf32, #tpu.memory_space<vmem>>, vector<1x1x2x32xf32>
    %46 = vector.shape_cast %45 : vector<1x1x2x32xf32> to vector<2x32xf32>
    %47 = vector.shape_cast %43 : vector<2x32xf32> to vector<1x1x2x32xf32>
    tpu.vector_store %arg5[%c0_14, %44, %c0_15, %c0_16], %47 {strides = array<i32>} : memref<1x8x2x32xf32, #tpu.memory_space<vmem>>, vector<1x1x2x32xf32>,
    %c1_i32_17 = arith.constant 1 : i32
    %c1_i32_18 = arith.constant 1 : i32
    %48 = arith.subi %c1_i32_18, %arg0 : i32
    %49 = arith.muli %48, %c1_i32_17 : i32
    %c7_i32_19 = arith.constant 7 : i32
    %50 = arith.subi %c7_i32_19, %c1_i32_17 : i32
    %51 = arith.muli %arg0, %50 : i32
    %52 = arith.addi %49, %51 : i32
    %c0_20 = arith.constant 0 : index
    %53 = arith.index_cast %52 : i32 to index
    %c0_21 = arith.constant 0 : index
    %c0_22 = arith.constant 0 : index
    %54 = vector.load %arg2[%c0_20, %53, %c0_21, %c0_22] : memref<1x8x2x96xf32, #tpu.memory_space<vmem>>, vector<1x1x2x96xf32>
    %55 = vector.shape_cast %54 : vector<1x1x2x96xf32> to vector<2x96xf32>
    %cst_23 = arith.constant dense<0.000000e+00> : vector<2x96xf32>
    %56 = tpu.matmul %43, %4, %cst_23 {dimension_numbers = #tpu.dot_dimension_numbers<[1], [0], [0], [1], [0, 0, 1, 1], [], []>} : vector<2x32xf32>, vector<32x96xf32>, vector<2x96xf32> -> vector<2x96xf32>
    %57 = vector.extract_strided_slice %55 {offsets = [0, 0], sizes = [2, 32], strides = [1, 1]} : vector<2x96xf32> to vector<2x32xf32>
    %58 = vector.extract_strided_slice %56 {offsets = [0, 0], sizes = [2, 32], strides = [1, 1]} : vector<2x96xf32> to vector<2x32xf32>
    %59 = arith.addf %57, %58 : vector<2x32xf32>
    %60 = arith.negf %59 : vector<2x32xf32>
    %61 = math.exp %60 : vector<2x32xf32>
    %cst_24 = arith.constant 1.000000e+00 : f32
    %62 = vector.broadcast %cst_24 : f32 to vector<2x32xf32>
    %63 = arith.addf %62, %61 : vector<2x32xf32>
    %64 = arith.divf %62, %63 : vector<2x32xf32>
    %65 = vector.extract_strided_slice %55 {offsets = [0, 32], sizes = [2, 32], strides = [1, 1]} : vector<2x96xf32> to vector<2x32xf32>
    %66 = vector.extract_strided_slice %56 {offsets = [0, 32], sizes = [2, 32], strides = [1, 1]} : vector<2x96xf32> to vector<2x32xf32>
    %67 = arith.addf %65, %66 : vector<2x32xf32>
    %68 = arith.negf %67 : vector<2x32xf32>
    %69 = math.exp %68 : vector<2x32xf32>
    %cst_25 = arith.constant 1.000000e+00 : f32
    %70 = vector.broadcast %cst_25 : f32 to vector<2x32xf32>
    %71 = arith.addf %70, %69 : vector<2x32xf32>
    %72 = arith.divf %70, %71 : vector<2x32xf32>
    %73 = vector.extract_strided_slice %55 {offsets = [0, 64], sizes = [2, 32], strides = [1, 1]} : vector<2x96xf32> to vector<2x32xf32>
    %74 = vector.extract_strided_slice %56 {offsets = [0, 64], sizes = [2, 32], strides = [1, 1]} : vector<2x96xf32> to vector<2x32xf32>
    %75 = arith.addf %74, %8 : vector<2x32xf32>
    %76 = arith.mulf %64, %75 : vector<2x32xf32>
    %77 = arith.addf %73, %76 : vector<2x32xf32>
    %78 = math.tanh %77 : vector<2x32xf32>
    %79 = arith.subf %43, %78 : vector<2x32xf32>
    %80 = arith.mulf %72, %79 : vector<2x32xf32>
    %81 = arith.addf %78, %80 : vector<2x32xf32>
    %c0_26 = arith.constant 0 : index
    %82 = arith.index_cast %52 : i32 to index
    %c0_27 = arith.constant 0 : index
    %c0_28 = arith.constant 0 : index
    %83 = vector.load %arg5[%c0_26, %82, %c0_27, %c0_28] : memref<1x8x2x32xf32, #tpu.memory_space<vmem>>, vector<1x1x2x32xf32>
    %84 = vector.shape_cast %83 : vector<1x1x2x32xf32> to vector<2x32xf32>
    %85 = vector.shape_cast %81 : vector<2x32xf32> to vector<1x1x2x32xf32>
    tpu.vector_store %arg5[%c0_26, %82, %c0_27, %c0_28], %85 {strides = array<i32>} : memref<1x8x2x32xf32, #tpu.memory_space<vmem>>, vector<1x1x2x32xf32>,
    %c2_i32 = arith.constant 2 : i32
    %c1_i32_29 = arith.constant 1 : i32
    %86 = arith.subi %c1_i32_29, %arg0 : i32
    %87 = arith.muli %86, %c2_i32 : i32
    %c7_i32_30 = arith.constant 7 : i32
    %88 = arith.subi %c7_i32_30, %c2_i32 : i32
    %89 = arith.muli %arg0, %88 : i32
    %90 = arith.addi %87, %89 : i32
    %c0_31 = arith.constant 0 : index
    %91 = arith.index_cast %90 : i32 to index
    %c0_32 = arith.constant 0 : index
    %c0_33 = arith.constant 0 : index
    %92 = vector.load %arg2[%c0_31, %91, %c0_32, %c0_33] : memref<1x8x2x96xf32, #tpu.memory_space<vmem>>, vector<1x1x2x96xf32>
    %93 = vector.shape_cast %92 : vector<1x1x2x96xf32> to vector<2x96xf32>
    %cst_34 = arith.constant dense<0.000000e+00> : vector<2x96xf32>
    %94 = tpu.matmul %81, %4, %cst_34 {dimension_numbers = #tpu.dot_dimension_numbers<[1], [0], [0], [1], [0, 0, 1, 1], [], []>} : vector<2x32xf32>, vector<32x96xf32>, vector<2x96xf32> -> vector<2x96xf32>
    %95 = vector.extract_strided_slice %93 {offsets = [0, 0], sizes = [2, 32], strides = [1, 1]} : vector<2x96xf32> to vector<2x32xf32>
    %96 = vector.extract_strided_slice %94 {offsets = [0, 0], sizes = [2, 32], strides = [1, 1]} : vector<2x96xf32> to vector<2x32xf32>
    %97 = arith.addf %95, %96 : vector<2x32xf32>
    %98 = arith.negf %97 : vector<2x32xf32>
    %99 = math.exp %98 : vector<2x32xf32>
    %cst_35 = arith.constant 1.000000e+00 : f32
    %100 = vector.broadcast %cst_35 : f32 to vector<2x32xf32>
    %101 = arith.addf %100, %99 : vector<2x32xf32>
    %102 = arith.divf %100, %101 : vector<2x32xf32>
    %103 = vector.extract_strided_slice %93 {offsets = [0, 32], sizes = [2, 32], strides = [1, 1]} : vector<2x96xf32> to vector<2x32xf32>
    %104 = vector.extract_strided_slice %94 {offsets = [0, 32], sizes = [2, 32], strides = [1, 1]} : vector<2x96xf32> to vector<2x32xf32>
    %105 = arith.addf %103, %104 : vector<2x32xf32>
    %106 = arith.negf %105 : vector<2x32xf32>
    %107 = math.exp %106 : vector<2x32xf32>
    %cst_36 = arith.constant 1.000000e+00 : f32
    %108 = vector.broadcast %cst_36 : f32 to vector<2x32xf32>
    %109 = arith.addf %108, %107 : vector<2x32xf32>
    %110 = arith.divf %108, %109 : vector<2x32xf32>
    %111 = vector.extract_strided_slice %93 {offsets = [0, 64], sizes = [2, 32], strides = [1, 1]} : vector<2x96xf32> to vector<2x32xf32>
    %112 = vector.extract_strided_slice %94 {offsets = [0, 64], sizes = [2, 32], strides = [1, 1]} : vector<2x96xf32> to vector<2x32xf32>
    %113 = arith.addf %112, %8 : vector<2x32xf32>
    %114 = arith.mulf %102, %113 : vector<2x32xf32>
    %115 = arith.addf %111, %114 : vector<2x32xf32>
    %116 = math.tanh %115 : vector<2x32xf32>
    %117 = arith.subf %81, %116 : vector<2x32xf32>
    %118 = arith.mulf %110, %117 : vector<2x32xf32>
    %119 = arith.addf %116, %118 : vector<2x32xf32>
    %c0_37 = arith.constant 0 : index
    %120 = arith.index_cast %90 : i32 to index
    %c0_38 = arith.constant 0 : index
    %c0_39 = arith.constant 0 : index
    %121 = vector.load %arg5[%c0_37, %120, %c0_38, %c0_39] : memref<1x8x2x32xf32, #tpu.memory_space<vmem>>, vector<1x1x2x32xf32>
    %122 = vector.shape_cast %121 : vector<1x1x2x32xf32> to vector<2x32xf32>
    %123 = vector.shape_cast %119 : vector<2x32xf32> to vector<1x1x2x32xf32>
    tpu.vector_store %arg5[%c0_37, %120, %c0_38, %c0_39], %123 {strides = array<i32>} : memref<1x8x2x32xf32, #tpu.memory_space<vmem>>, vector<1x1x2x32xf32>,
    %c3_i32 = arith.constant 3 : i32
    %c1_i32_40 = arith.constant 1 : i32
    %124 = arith.subi %c1_i32_40, %arg0 : i32
    %125 = arith.muli %124, %c3_i32 : i32
    %c7_i32_41 = arith.constant 7 : i32
    %126 = arith.subi %c7_i32_41, %c3_i32 : i32
    %127 = arith.muli %arg0, %126 : i32
    %128 = arith.addi %125, %127 : i32
    %c0_42 = arith.constant 0 : index
    %129 = arith.index_cast %128 : i32 to index
    %c0_43 = arith.constant 0 : index
    %c0_44 = arith.constant 0 : index
    %130 = vector.load %arg2[%c0_42, %129, %c0_43, %c0_44] : memref<1x8x2x96xf32, #tpu.memory_space<vmem>>, vector<1x1x2x96xf32>
    %131 = vector.shape_cast %130 : vector<1x1x2x96xf32> to vector<2x96xf32>
    %cst_45 = arith.constant dense<0.000000e+00> : vector<2x96xf32>
    %132 = tpu.matmul %119, %4, %cst_45 {dimension_numbers = #tpu.dot_dimension_numbers<[1], [0], [0], [1], [0, 0, 1, 1], [], []>} : vector<2x32xf32>, vector<32x96xf32>, vector<2x96xf32> -> vector<2x96xf32>
    %133 = vector.extract_strided_slice %131 {offsets = [0, 0], sizes = [2, 32], strides = [1, 1]} : vector<2x96xf32> to vector<2x32xf32>
    %134 = vector.extract_strided_slice %132 {offsets = [0, 0], sizes = [2, 32], strides = [1, 1]} : vector<2x96xf32> to vector<2x32xf32>
    %135 = arith.addf %133, %134 : vector<2x32xf32>
    %136 = arith.negf %135 : vector<2x32xf32>
    %137 = math.exp %136 : vector<2x32xf32>
    %cst_46 = arith.constant 1.000000e+00 : f32
    %138 = vector.broadcast %cst_46 : f32 to vector<2x32xf32>
    %139 = arith.addf %138, %137 : vector<2x32xf32>
    %140 = arith.divf %138, %139 : vector<2x32xf32>
    %141 = vector.extract_strided_slice %131 {offsets = [0, 32], sizes = [2, 32], strides = [1, 1]} : vector<2x96xf32> to vector<2x32xf32>
    %142 = vector.extract_strided_slice %132 {offsets = [0, 32], sizes = [2, 32], strides = [1, 1]} : vector<2x96xf32> to vector<2x32xf32>
    %143 = arith.addf %141, %142 : vector<2x32xf32>
    %144 = arith.negf %143 : vector<2x32xf32>
    %145 = math.exp %144 : vector<2x32xf32>
    %cst_47 = arith.constant 1.000000e+00 : f32
    %146 = vector.broadcast %cst_47 : f32 to vector<2x32xf32>
    %147 = arith.addf %146, %145 : vector<2x32xf32>
    %148 = arith.divf %146, %147 : vector<2x32xf32>
    %149 = vector.extract_strided_slice %131 {offsets = [0, 64], sizes = [2, 32], strides = [1, 1]} : vector<2x96xf32> to vector<2x32xf32>
    %150 = vector.extract_strided_slice %132 {offsets = [0, 64], sizes = [2, 32], strides = [1, 1]} : vector<2x96xf32> to vector<2x32xf32>
    %151 = arith.addf %150, %8 : vector<2x32xf32>
    %152 = arith.mulf %140, %151 : vector<2x32xf32>
    %153 = arith.addf %149, %152 : vector<2x32xf32>
    %154 = math.tanh %153 : vector<2x32xf32>
    %155 = arith.subf %119, %154 : vector<2x32xf32>
    %156 = arith.mulf %148, %155 : vector<2x32xf32>
    %157 = arith.addf %154, %156 : vector<2x32xf32>
    %c0_48 = arith.constant 0 : index
    %158 = arith.index_cast %128 : i32 to index
    %c0_49 = arith.constant 0 : index
    %c0_50 = arith.constant 0 : index
    %159 = vector.load %arg5[%c0_48, %158, %c0_49, %c0_50] : memref<1x8x2x32xf32, #tpu.memory_space<vmem>>, vector<1x1x2x32xf32>
    %160 = vector.shape_cast %159 : vector<1x1x2x32xf32> to vector<2x32xf32>
    %161 = vector.shape_cast %157 : vector<2x32xf32> to vector<1x1x2x32xf32>
    tpu.vector_store %arg5[%c0_48, %158, %c0_49, %c0_50], %161 {strides = array<i32>} : memref<1x8x2x32xf32, #tpu.memory_space<vmem>>, vector<1x1x2x32xf32>,
    %c4_i32 = arith.constant 4 : i32
    %c1_i32_51 = arith.constant 1 : i32
    %162 = arith.subi %c1_i32_51, %arg0 : i32
    %163 = arith.muli %162, %c4_i32 : i32
    %c7_i32_52 = arith.constant 7 : i32
    %164 = arith.subi %c7_i32_52, %c4_i32 : i32
    %165 = arith.muli %arg0, %164 : i32
    %166 = arith.addi %163, %165 : i32
    %c0_53 = arith.constant 0 : index
    %167 = arith.index_cast %166 : i32 to index
    %c0_54 = arith.constant 0 : index
    %c0_55 = arith.constant 0 : index
    %168 = vector.load %arg2[%c0_53, %167, %c0_54, %c0_55] : memref<1x8x2x96xf32, #tpu.memory_space<vmem>>, vector<1x1x2x96xf32>
    %169 = vector.shape_cast %168 : vector<1x1x2x96xf32> to vector<2x96xf32>
    %cst_56 = arith.constant dense<0.000000e+00> : vector<2x96xf32>
    %170 = tpu.matmul %157, %4, %cst_56 {dimension_numbers = #tpu.dot_dimension_numbers<[1], [0], [0], [1], [0, 0, 1, 1], [], []>} : vector<2x32xf32>, vector<32x96xf32>, vector<2x96xf32> -> vector<2x96xf32>
    %171 = vector.extract_strided_slice %169 {offsets = [0, 0], sizes = [2, 32], strides = [1, 1]} : vector<2x96xf32> to vector<2x32xf32>
    %172 = vector.extract_strided_slice %170 {offsets = [0, 0], sizes = [2, 32], strides = [1, 1]} : vector<2x96xf32> to vector<2x32xf32>
    %173 = arith.addf %171, %172 : vector<2x32xf32>
    %174 = arith.negf %173 : vector<2x32xf32>
    %175 = math.exp %174 : vector<2x32xf32>
    %cst_57 = arith.constant 1.000000e+00 : f32
    %176 = vector.broadcast %cst_57 : f32 to vector<2x32xf32>
    %177 = arith.addf %176, %175 : vector<2x32xf32>
    %178 = arith.divf %176, %177 : vector<2x32xf32>
    %179 = vector.extract_strided_slice %169 {offsets = [0, 32], sizes = [2, 32], strides = [1, 1]} : vector<2x96xf32> to vector<2x32xf32>
    %180 = vector.extract_strided_slice %170 {offsets = [0, 32], sizes = [2, 32], strides = [1, 1]} : vector<2x96xf32> to vector<2x32xf32>
    %181 = arith.addf %179, %180 : vector<2x32xf32>
    %182 = arith.negf %181 : vector<2x32xf32>
    %183 = math.exp %182 : vector<2x32xf32>
    %cst_58 = arith.constant 1.000000e+00 : f32
    %184 = vector.broadcast %cst_58 : f32 to vector<2x32xf32>
    %185 = arith.addf %184, %183 : vector<2x32xf32>
    %186 = arith.divf %184, %185 : vector<2x32xf32>
    %187 = vector.extract_strided_slice %169 {offsets = [0, 64], sizes = [2, 32], strides = [1, 1]} : vector<2x96xf32> to vector<2x32xf32>
    %188 = vector.extract_strided_slice %170 {offsets = [0, 64], sizes = [2, 32], strides = [1, 1]} : vector<2x96xf32> to vector<2x32xf32>
    %189 = arith.addf %188, %8 : vector<2x32xf32>
    %190 = arith.mulf %178, %189 : vector<2x32xf32>
    %191 = arith.addf %187, %190 : vector<2x32xf32>
    %192 = math.tanh %191 : vector<2x32xf32>
    %193 = arith.subf %157, %192 : vector<2x32xf32>
    %194 = arith.mulf %186, %193 : vector<2x32xf32>
    %195 = arith.addf %192, %194 : vector<2x32xf32>
    %c0_59 = arith.constant 0 : index
    %196 = arith.index_cast %166 : i32 to index
    %c0_60 = arith.constant 0 : index
    %c0_61 = arith.constant 0 : index
    %197 = vector.load %arg5[%c0_59, %196, %c0_60, %c0_61] : memref<1x8x2x32xf32, #tpu.memory_space<vmem>>, vector<1x1x2x32xf32>
    %198 = vector.shape_cast %197 : vector<1x1x2x32xf32> to vector<2x32xf32>
    %199 = vector.shape_cast %195 : vector<2x32xf32> to vector<1x1x2x32xf32>
    tpu.vector_store %arg5[%c0_59, %196, %c0_60, %c0_61], %199 {strides = array<i32>} : memref<1x8x2x32xf32, #tpu.memory_space<vmem>>, vector<1x1x2x32xf32>,
    %c5_i32 = arith.constant 5 : i32
    %c1_i32_62 = arith.constant 1 : i32
    %200 = arith.subi %c1_i32_62, %arg0 : i32
    %201 = arith.muli %200, %c5_i32 : i32
    %c7_i32_63 = arith.constant 7 : i32
    %202 = arith.subi %c7_i32_63, %c5_i32 : i32
    %203 = arith.muli %arg0, %202 : i32
    %204 = arith.addi %201, %203 : i32
    %c0_64 = arith.constant 0 : index
    %205 = arith.index_cast %204 : i32 to index
    %c0_65 = arith.constant 0 : index
    %c0_66 = arith.constant 0 : index
    %206 = vector.load %arg2[%c0_64, %205, %c0_65, %c0_66] : memref<1x8x2x96xf32, #tpu.memory_space<vmem>>, vector<1x1x2x96xf32>
    %207 = vector.shape_cast %206 : vector<1x1x2x96xf32> to vector<2x96xf32>
    %cst_67 = arith.constant dense<0.000000e+00> : vector<2x96xf32>
    %208 = tpu.matmul %195, %4, %cst_67 {dimension_numbers = #tpu.dot_dimension_numbers<[1], [0], [0], [1], [0, 0, 1, 1], [], []>} : vector<2x32xf32>, vector<32x96xf32>, vector<2x96xf32> -> vector<2x96xf32>
    %209 = vector.extract_strided_slice %207 {offsets = [0, 0], sizes = [2, 32], strides = [1, 1]} : vector<2x96xf32> to vector<2x32xf32>
    %210 = vector.extract_strided_slice %208 {offsets = [0, 0], sizes = [2, 32], strides = [1, 1]} : vector<2x96xf32> to vector<2x32xf32>
    %211 = arith.addf %209, %210 : vector<2x32xf32>
    %212 = arith.negf %211 : vector<2x32xf32>
    %213 = math.exp %212 : vector<2x32xf32>
    %cst_68 = arith.constant 1.000000e+00 : f32
    %214 = vector.broadcast %cst_68 : f32 to vector<2x32xf32>
    %215 = arith.addf %214, %213 : vector<2x32xf32>
    %216 = arith.divf %214, %215 : vector<2x32xf32>
    %217 = vector.extract_strided_slice %207 {offsets = [0, 32], sizes = [2, 32], strides = [1, 1]} : vector<2x96xf32> to vector<2x32xf32>
    %218 = vector.extract_strided_slice %208 {offsets = [0, 32], sizes = [2, 32], strides = [1, 1]} : vector<2x96xf32> to vector<2x32xf32>
    %219 = arith.addf %217, %218 : vector<2x32xf32>
    %220 = arith.negf %219 : vector<2x32xf32>
    %221 = math.exp %220 : vector<2x32xf32>
    %cst_69 = arith.constant 1.000000e+00 : f32
    %222 = vector.broadcast %cst_69 : f32 to vector<2x32xf32>
    %223 = arith.addf %222, %221 : vector<2x32xf32>
    %224 = arith.divf %222, %223 : vector<2x32xf32>
    %225 = vector.extract_strided_slice %207 {offsets = [0, 64], sizes = [2, 32], strides = [1, 1]} : vector<2x96xf32> to vector<2x32xf32>
    %226 = vector.extract_strided_slice %208 {offsets = [0, 64], sizes = [2, 32], strides = [1, 1]} : vector<2x96xf32> to vector<2x32xf32>
    %227 = arith.addf %226, %8 : vector<2x32xf32>
    %228 = arith.mulf %216, %227 : vector<2x32xf32>
    %229 = arith.addf %225, %228 : vector<2x32xf32>
    %230 = math.tanh %229 : vector<2x32xf32>
    %231 = arith.subf %195, %230 : vector<2x32xf32>
    %232 = arith.mulf %224, %231 : vector<2x32xf32>
    %233 = arith.addf %230, %232 : vector<2x32xf32>
    %c0_70 = arith.constant 0 : index
    %234 = arith.index_cast %204 : i32 to index
    %c0_71 = arith.constant 0 : index
    %c0_72 = arith.constant 0 : index
    %235 = vector.load %arg5[%c0_70, %234, %c0_71, %c0_72] : memref<1x8x2x32xf32, #tpu.memory_space<vmem>>, vector<1x1x2x32xf32>
    %236 = vector.shape_cast %235 : vector<1x1x2x32xf32> to vector<2x32xf32>
    %237 = vector.shape_cast %233 : vector<2x32xf32> to vector<1x1x2x32xf32>
    tpu.vector_store %arg5[%c0_70, %234, %c0_71, %c0_72], %237 {strides = array<i32>} : memref<1x8x2x32xf32, #tpu.memory_space<vmem>>, vector<1x1x2x32xf32>,
    %c6_i32 = arith.constant 6 : i32
    %c1_i32_73 = arith.constant 1 : i32
    %238 = arith.subi %c1_i32_73, %arg0 : i32
    %239 = arith.muli %238, %c6_i32 : i32
    %c7_i32_74 = arith.constant 7 : i32
    %240 = arith.subi %c7_i32_74, %c6_i32 : i32
    %241 = arith.muli %arg0, %240 : i32
    %242 = arith.addi %239, %241 : i32
    %c0_75 = arith.constant 0 : index
    %243 = arith.index_cast %242 : i32 to index
    %c0_76 = arith.constant 0 : index
    %c0_77 = arith.constant 0 : index
    %244 = vector.load %arg2[%c0_75, %243, %c0_76, %c0_77] : memref<1x8x2x96xf32, #tpu.memory_space<vmem>>, vector<1x1x2x96xf32>
    %245 = vector.shape_cast %244 : vector<1x1x2x96xf32> to vector<2x96xf32>
    %cst_78 = arith.constant dense<0.000000e+00> : vector<2x96xf32>
    %246 = tpu.matmul %233, %4, %cst_78 {dimension_numbers = #tpu.dot_dimension_numbers<[1], [0], [0], [1], [0, 0, 1, 1], [], []>} : vector<2x32xf32>, vector<32x96xf32>, vector<2x96xf32> -> vector<2x96xf32>
    %247 = vector.extract_strided_slice %245 {offsets = [0, 0], sizes = [2, 32], strides = [1, 1]} : vector<2x96xf32> to vector<2x32xf32>
    %248 = vector.extract_strided_slice %246 {offsets = [0, 0], sizes = [2, 32], strides = [1, 1]} : vector<2x96xf32> to vector<2x32xf32>
    %249 = arith.addf %247, %248 : vector<2x32xf32>
    %250 = arith.negf %249 : vector<2x32xf32>
    %251 = math.exp %250 : vector<2x32xf32>
    %cst_79 = arith.constant 1.000000e+00 : f32
    %252 = vector.broadcast %cst_79 : f32 to vector<2x32xf32>
    %253 = arith.addf %252, %251 : vector<2x32xf32>
    %254 = arith.divf %252, %253 : vector<2x32xf32>
    %255 = vector.extract_strided_slice %245 {offsets = [0, 32], sizes = [2, 32], strides = [1, 1]} : vector<2x96xf32> to vector<2x32xf32>
    %256 = vector.extract_strided_slice %246 {offsets = [0, 32], sizes = [2, 32], strides = [1, 1]} : vector<2x96xf32> to vector<2x32xf32>
    %257 = arith.addf %255, %256 : vector<2x32xf32>
    %258 = arith.negf %257 : vector<2x32xf32>
    %259 = math.exp %258 : vector<2x32xf32>
    %cst_80 = arith.constant 1.000000e+00 : f32
    %260 = vector.broadcast %cst_80 : f32 to vector<2x32xf32>
    %261 = arith.addf %260, %259 : vector<2x32xf32>
    %262 = arith.divf %260, %261 : vector<2x32xf32>
    %263 = vector.extract_strided_slice %245 {offsets = [0, 64], sizes = [2, 32], strides = [1, 1]} : vector<2x96xf32> to vector<2x32xf32>
    %264 = vector.extract_strided_slice %246 {offsets = [0, 64], sizes = [2, 32], strides = [1, 1]} : vector<2x96xf32> to vector<2x32xf32>
    %265 = arith.addf %264, %8 : vector<2x32xf32>
    %266 = arith.mulf %254, %265 : vector<2x32xf32>
    %267 = arith.addf %263, %266 : vector<2x32xf32>
    %268 = math.tanh %267 : vector<2x32xf32>
    %269 = arith.subf %233, %268 : vector<2x32xf32>
    %270 = arith.mulf %262, %269 : vector<2x32xf32>
    %271 = arith.addf %268, %270 : vector<2x32xf32>
    %c0_81 = arith.constant 0 : index
    %272 = arith.index_cast %242 : i32 to index
    %c0_82 = arith.constant 0 : index
    %c0_83 = arith.constant 0 : index
    %273 = vector.load %arg5[%c0_81, %272, %c0_82, %c0_83] : memref<1x8x2x32xf32, #tpu.memory_space<vmem>>, vector<1x1x2x32xf32>
    %274 = vector.shape_cast %273 : vector<1x1x2x32xf32> to vector<2x32xf32>
    %275 = vector.shape_cast %271 : vector<2x32xf32> to vector<1x1x2x32xf32>
    tpu.vector_store %arg5[%c0_81, %272, %c0_82, %c0_83], %275 {strides = array<i32>} : memref<1x8x2x32xf32, #tpu.memory_space<vmem>>, vector<1x1x2x32xf32>,
    %c7_i32_84 = arith.constant 7 : i32
    %c1_i32_85 = arith.constant 1 : i32
    %276 = arith.subi %c1_i32_85, %arg0 : i32
    %277 = arith.muli %276, %c7_i32_84 : i32
    %c7_i32_86 = arith.constant 7 : i32
    %278 = arith.subi %c7_i32_86, %c7_i32_84 : i32
    %279 = arith.muli %arg0, %278 : i32
    %280 = arith.addi %277, %279 : i32
    %c0_87 = arith.constant 0 : index
    %281 = arith.index_cast %280 : i32 to index
    %c0_88 = arith.constant 0 : index
    %c0_89 = arith.constant 0 : index
    %282 = vector.load %arg2[%c0_87, %281, %c0_88, %c0_89] : memref<1x8x2x96xf32, #tpu.memory_space<vmem>>, vector<1x1x2x96xf32>
    %283 = vector.shape_cast %282 : vector<1x1x2x96xf32> to vector<2x96xf32>
    %cst_90 = arith.constant dense<0.000000e+00> : vector<2x96xf32>
    %284 = tpu.matmul %271, %4, %cst_90 {dimension_numbers = #tpu.dot_dimension_numbers<[1], [0], [0], [1], [0, 0, 1, 1], [], []>} : vector<2x32xf32>, vector<32x96xf32>, vector<2x96xf32> -> vector<2x96xf32>
    %285 = vector.extract_strided_slice %283 {offsets = [0, 0], sizes = [2, 32], strides = [1, 1]} : vector<2x96xf32> to vector<2x32xf32>
    %286 = vector.extract_strided_slice %284 {offsets = [0, 0], sizes = [2, 32], strides = [1, 1]} : vector<2x96xf32> to vector<2x32xf32>
    %287 = arith.addf %285, %286 : vector<2x32xf32>
    %288 = arith.negf %287 : vector<2x32xf32>
    %289 = math.exp %288 : vector<2x32xf32>
    %cst_91 = arith.constant 1.000000e+00 : f32
    %290 = vector.broadcast %cst_91 : f32 to vector<2x32xf32>
    %291 = arith.addf %290, %289 : vector<2x32xf32>
    %292 = arith.divf %290, %291 : vector<2x32xf32>
    %293 = vector.extract_strided_slice %283 {offsets = [0, 32], sizes = [2, 32], strides = [1, 1]} : vector<2x96xf32> to vector<2x32xf32>
    %294 = vector.extract_strided_slice %284 {offsets = [0, 32], sizes = [2, 32], strides = [1, 1]} : vector<2x96xf32> to vector<2x32xf32>
    %295 = arith.addf %293, %294 : vector<2x32xf32>
    %296 = arith.negf %295 : vector<2x32xf32>
    %297 = math.exp %296 : vector<2x32xf32>
    %cst_92 = arith.constant 1.000000e+00 : f32
    %298 = vector.broadcast %cst_92 : f32 to vector<2x32xf32>
    %299 = arith.addf %298, %297 : vector<2x32xf32>
    %300 = arith.divf %298, %299 : vector<2x32xf32>
    %301 = vector.extract_strided_slice %283 {offsets = [0, 64], sizes = [2, 32], strides = [1, 1]} : vector<2x96xf32> to vector<2x32xf32>
    %302 = vector.extract_strided_slice %284 {offsets = [0, 64], sizes = [2, 32], strides = [1, 1]} : vector<2x96xf32> to vector<2x32xf32>
    %303 = arith.addf %302, %8 : vector<2x32xf32>
    %304 = arith.mulf %292, %303 : vector<2x32xf32>
    %305 = arith.addf %301, %304 : vector<2x32xf32>
    %306 = math.tanh %305 : vector<2x32xf32>
    %307 = arith.subf %271, %306 : vector<2x32xf32>
    %308 = arith.mulf %300, %307 : vector<2x32xf32>
    %309 = arith.addf %306, %308 : vector<2x32xf32>
    %c0_93 = arith.constant 0 : index
    %310 = arith.index_cast %280 : i32 to index
    %c0_94 = arith.constant 0 : index
    %c0_95 = arith.constant 0 : index
    %311 = vector.load %arg5[%c0_93, %310, %c0_94, %c0_95] : memref<1x8x2x32xf32, #tpu.memory_space<vmem>>, vector<1x1x2x32xf32>
    %312 = vector.shape_cast %311 : vector<1x1x2x32xf32> to vector<2x32xf32>
    %313 = vector.shape_cast %309 : vector<2x32xf32> to vector<1x1x2x32xf32>
    tpu.vector_store %arg5[%c0_93, %310, %c0_94, %c0_95], %313 {strides = array<i32>} : memref<1x8x2x32xf32, #tpu.memory_space<vmem>>, vector<1x1x2x32xf32>,
    %c8_i32 = arith.constant 8 : i32
    %c0_96 = arith.constant 0 : index
    %c0_97 = arith.constant 0 : index
    %314 = vector.load %arg7[%c0_96, %c0_97] : memref<2x32xf32, #tpu.memory_space<vmem>>, vector<2x32xf32>
    tpu.vector_store %arg7[%c0_96, %c0_97], %309 {strides = array<i32>} : memref<2x32xf32, #tpu.memory_space<vmem>>, vector<2x32xf32>,
    %c0_98 = arith.constant 0 : index
    %c0_99 = arith.constant 0 : index
    %c0_100 = arith.constant 0 : index
    %315 = vector.load %arg6[%c0_98, %c0_99, %c0_100] : memref<1x2x32xf32, #tpu.memory_space<vmem>>, vector<1x2x32xf32>
    %316 = vector.shape_cast %315 : vector<1x2x32xf32> to vector<2x32xf32>
    %317 = vector.shape_cast %309 : vector<2x32xf32> to vector<1x2x32xf32>
    tpu.vector_store %arg6[%c0_98, %c0_99, %c0_100], %317 {strides = array<i32>} : memref<1x2x32xf32, #tpu.memory_space<vmem>>, vector<1x2x32xf32>,
    return
  }
  func.func @transform_0(%arg0: i32, %arg1: i32) -> (i32, i32, i32, i32) {
    %c1_i32 = arith.constant 1 : i32
    %0 = arith.subi %c1_i32, %arg0 : i32
    %1 = arith.muli %0, %arg1 : i32
    %c0_i32 = arith.constant 0 : i32
    %2 = arith.subi %c0_i32, %arg1 : i32
    %3 = arith.muli %arg0, %2 : i32
    %4 = arith.addi %1, %3 : i32
    %c0_i32_0 = arith.constant 0 : i32
    %c0_i32_1 = arith.constant 0 : i32
    %c0_i32_2 = arith.constant 0 : i32
    return %arg0, %4, %c0_i32_0, %c0_i32_1 : i32, i32, i32, i32
  }
  func.func @transform_1(%arg0: i32, %arg1: i32) -> (i32, i32, i32) {
    %c0_i32 = arith.constant 0 : i32
    %c0_i32_0 = arith.constant 0 : i32
    %c0_i32_1 = arith.constant 0 : i32
    return %arg0, %c0_i32, %c0_i32_0 : i32, i32, i32
  }
  func.func @transform_2(%arg0: i32, %arg1: i32) -> (i32, i32, i32) {
    %c0_i32 = arith.constant 0 : i32
    %c0_i32_0 = arith.constant 0 : i32
    %c0_i32_1 = arith.constant 0 : i32
    return %arg0, %c0_i32, %c0_i32_0 : i32, i32, i32
  }
  func.func @transform_3(%arg0: i32, %arg1: i32) -> (i32, i32, i32, i32) {
    %c1_i32 = arith.constant 1 : i32
    %0 = arith.subi %c1_i32, %arg0 : i32
    %1 = arith.muli %0, %arg1 : i32
    %c0_i32 = arith.constant 0 : i32
    %2 = arith.subi %c0_i32, %arg1 : i32
    %3 = arith.muli %arg0, %2 : i32
    %4 = arith.addi %1, %3 : i32
    %c0_i32_0 = arith.constant 0 : i32
    %c0_i32_1 = arith.constant 0 : i32
    %c0_i32_2 = arith.constant 0 : i32
    return %arg0, %4, %c0_i32_0, %c0_i32_1 : i32, i32, i32, i32
  }
  func.func @transform_4(%arg0: i32, %arg1: i32) -> (i32, i32, i32) {
    %c0_i32 = arith.constant 0 : i32
    %c0_i32_0 = arith.constant 0 : i32
    %c0_i32_1 = arith.constant 0 : i32
    return %arg0, %c0_i32, %c0_i32_0 : i32, i32, i32
  }
}

module attributes {stable_mosaic.version = 11 : i64} {
  func.func @_dense_kernel(%arg0: i32, %arg1: memref<16x64xf32, #tpu.memory_space<vmem>>, %arg2: memref<64x192xf32, #tpu.memory_space<vmem>>, %arg3: memref<1x192xf32, #tpu.memory_space<vmem>>, %arg4: memref<16x192xf32, #tpu.memory_space<vmem>>) attributes {dimension_semantics = [#tpu.dimension_semantics<parallel>], iteration_bounds = array<i64: 1>, scalar_prefetch = 0 : i64, scratch_operands = 0 : i64, tpu.core_type = #tpu.core_type<tc>, window_params = [{transform_indices = @transform_0, window_bounds = array<i64: 16, 64>}, {pipeline_mode = #tpu.pipeline_mode<synchronous>, transform_indices = @transform_1, window_bounds = array<i64: 64, 192>}, {pipeline_mode = #tpu.pipeline_mode<synchronous>, transform_indices = @transform_2, window_bounds = array<i64: 1, 192>}, {transform_indices = @transform_3, window_bounds = array<i64: 16, 192>}]} {
    %c0 = arith.constant 0 : index
    %c0_0 = arith.constant 0 : index
    %0 = vector.load %arg1[%c0, %c0_0] : memref<16x64xf32, #tpu.memory_space<vmem>>, vector<16x64xf32>
    %c0_1 = arith.constant 0 : index
    %c0_2 = arith.constant 0 : index
    %1 = vector.load %arg2[%c0_1, %c0_2] : memref<64x192xf32, #tpu.memory_space<vmem>>, vector<64x192xf32>
    %cst = arith.constant dense<0.000000e+00> : vector<16x192xf32>
    %2 = tpu.matmul %0, %1, %cst {dimension_numbers = #tpu.dot_dimension_numbers<[1], [0], [0], [1], [0, 0, 1, 1], [], []>} : vector<16x64xf32>, vector<64x192xf32>, vector<16x192xf32> -> vector<16x192xf32>
    %c0_3 = arith.constant 0 : index
    %c0_4 = arith.constant 0 : index
    %3 = vector.load %arg3[%c0_3, %c0_4] : memref<1x192xf32, #tpu.memory_space<vmem>>, vector<1x192xf32>
    %4 = vector.broadcast %3 : vector<1x192xf32> to vector<16x192xf32>
    %5 = arith.addf %2, %4 : vector<16x192xf32>
    %c0_5 = arith.constant 0 : index
    %c0_6 = arith.constant 0 : index
    %6 = vector.load %arg4[%c0_5, %c0_6] : memref<16x192xf32, #tpu.memory_space<vmem>>, vector<16x192xf32>
    tpu.vector_store %arg4[%c0_5, %c0_6], %5 {strides = array<i32>} : memref<16x192xf32, #tpu.memory_space<vmem>>, vector<16x192xf32>,
    return
  }
  func.func @transform_0(%arg0: i32) -> (i32, i32) {
    %c0_i32 = arith.constant 0 : i32
    %c0_i32_0 = arith.constant 0 : i32
    return %arg0, %c0_i32 : i32, i32
  }
  func.func @transform_1(%arg0: i32) -> (i32, i32) {
    %c0_i32 = arith.constant 0 : i32
    %c0_i32_0 = arith.constant 0 : i32
    %c0_i32_1 = arith.constant 0 : i32
    return %c0_i32, %c0_i32_0 : i32, i32
  }
  func.func @transform_2(%arg0: i32) -> (i32, i32) {
    %c0_i32 = arith.constant 0 : i32
    %c0_i32_0 = arith.constant 0 : i32
    %c0_i32_1 = arith.constant 0 : i32
    return %c0_i32, %c0_i32_0 : i32, i32
  }
  func.func @transform_3(%arg0: i32) -> (i32, i32) {
    %c0_i32 = arith.constant 0 : i32
    %c0_i32_0 = arith.constant 0 : i32
    return %arg0, %c0_i32 : i32, i32
  }
}

module attributes {stable_mosaic.version = 11 : i64} {
  func.func @_attn_core_kernel(%arg0: i32, %arg1: memref<1x4x8x16xf32, #tpu.memory_space<vmem>>, %arg2: memref<1x4x8x16xf32, #tpu.memory_space<vmem>>, %arg3: memref<1x4x8x16xf32, #tpu.memory_space<vmem>>, %arg4: memref<1x4x8x16xf32, #tpu.memory_space<vmem>>) attributes {dimension_semantics = [#tpu.dimension_semantics<parallel>], iteration_bounds = array<i64: 2>, scalar_prefetch = 0 : i64, scratch_operands = 0 : i64, tpu.core_type = #tpu.core_type<tc>, window_params = [{transform_indices = @transform_0, window_bounds = array<i64: 1, 4, 8, 16>}, {transform_indices = @transform_1, window_bounds = array<i64: 1, 4, 8, 16>}, {transform_indices = @transform_2, window_bounds = array<i64: 1, 4, 8, 16>}, {transform_indices = @transform_3, window_bounds = array<i64: 1, 4, 8, 16>}]} {
    %c0 = arith.constant 0 : index
    %c0_0 = arith.constant 0 : index
    %c0_1 = arith.constant 0 : index
    %c0_2 = arith.constant 0 : index
    %0 = vector.load %arg1[%c0, %c0_0, %c0_1, %c0_2] : memref<1x4x8x16xf32, #tpu.memory_space<vmem>>, vector<1x4x8x16xf32>
    %1 = vector.shape_cast %0 : vector<1x4x8x16xf32> to vector<4x8x16xf32>
    %c0_3 = arith.constant 0 : index
    %c0_4 = arith.constant 0 : index
    %c0_5 = arith.constant 0 : index
    %c0_6 = arith.constant 0 : index
    %2 = vector.load %arg2[%c0_3, %c0_4, %c0_5, %c0_6] : memref<1x4x8x16xf32, #tpu.memory_space<vmem>>, vector<1x4x8x16xf32>
    %3 = vector.shape_cast %2 : vector<1x4x8x16xf32> to vector<4x8x16xf32>
    %c0_7 = arith.constant 0 : index
    %c0_8 = arith.constant 0 : index
    %c0_9 = arith.constant 0 : index
    %c0_10 = arith.constant 0 : index
    %4 = vector.load %arg3[%c0_7, %c0_8, %c0_9, %c0_10] : memref<1x4x8x16xf32, #tpu.memory_space<vmem>>, vector<1x4x8x16xf32>
    %5 = vector.shape_cast %4 : vector<1x4x8x16xf32> to vector<4x8x16xf32>
    "tpu.trace_start"() <{level = 10 : i32, message = "hqd,hkd->hqk"}> : () -> ()
    %cst = arith.constant dense<0.000000e+00> : vector<4x8x8xf32>
    %6 = tpu.matmul %1, %3, %cst {dimension_numbers = #tpu.dot_dimension_numbers<[2], [2], [1], [1], [0, 0, 0, 1, 1, 1], [0], [0]>} : vector<4x8x16xf32>, vector<4x8x16xf32>, vector<4x8x8xf32> -> vector<4x8x8xf32>
    "tpu.trace_stop"() : () -> ()
    %cst_11 = arith.constant 2.500000e-01 : f32
    %7 = vector.broadcast %cst_11 : f32 to vector<4x8x8xf32>
    %8 = arith.mulf %6, %7 : vector<4x8x8xf32>
    %cst_12 = arith.constant dense<0xFF800000> : vector<4x8xf32>
    %9 = vector.multi_reduction <maximumf>, %8, %cst_12 [2] : vector<4x8x8xf32> to vector<4x8xf32>
    %10 = vector.shape_cast %9 : vector<4x8xf32> to vector<4x8x1xf32>
    %11 = vector.broadcast %10 : vector<4x8x1xf32> to vector<4x8x8xf32>
    %12 = arith.subf %8, %11 : vector<4x8x8xf32>
    %13 = math.exp %12 : vector<4x8x8xf32>
    %cst_13 = arith.constant dense<0.000000e+00> : vector<4x8xf32>
    %14 = vector.multi_reduction <add>, %13, %cst_13 [2] : vector<4x8x8xf32> to vector<4x8xf32>
    %15 = vector.shape_cast %14 : vector<4x8xf32> to vector<4x8x1xf32>
    %16 = tpu.reciprocal %15 {approx = true} : vector<4x8x1xf32> -> vector<4x8x1xf32>
    %17 = vector.broadcast %16 : vector<4x8x1xf32> to vector<4x8x8xf32>
    %18 = arith.mulf %13, %17 : vector<4x8x8xf32>
    "tpu.trace_start"() <{level = 10 : i32, message = "hqk,hkd->hqd"}> : () -> ()
    %cst_14 = arith.constant dense<0.000000e+00> : vector<4x8x16xf32>
    %19 = tpu.matmul %18, %5, %cst_14 {dimension_numbers = #tpu.dot_dimension_numbers<[2], [1], [1], [2], [0, 0, 0, 1, 1, 2], [0], [0]>} : vector<4x8x8xf32>, vector<4x8x16xf32>, vector<4x8x16xf32> -> vector<4x8x16xf32>
    "tpu.trace_stop"() : () -> ()
    %c0_15 = arith.constant 0 : index
    %c0_16 = arith.constant 0 : index
    %c0_17 = arith.constant 0 : index
    %c0_18 = arith.constant 0 : index
    %20 = vector.load %arg4[%c0_15, %c0_16, %c0_17, %c0_18] : memref<1x4x8x16xf32, #tpu.memory_space<vmem>>, vector<1x4x8x16xf32>
    %21 = vector.shape_cast %20 : vector<1x4x8x16xf32> to vector<4x8x16xf32>
    %22 = vector.shape_cast %19 : vector<4x8x16xf32> to vector<1x4x8x16xf32>
    tpu.vector_store %arg4[%c0_15, %c0_16, %c0_17, %c0_18], %22 {strides = array<i32>} : memref<1x4x8x16xf32, #tpu.memory_space<vmem>>, vector<1x4x8x16xf32>,
    return
  }
  func.func @transform_0(%arg0: i32) -> (i32, i32, i32, i32) {
    %c0_i32 = arith.constant 0 : i32
    %c0_i32_0 = arith.constant 0 : i32
    %c0_i32_1 = arith.constant 0 : i32
    %c0_i32_2 = arith.constant 0 : i32
    return %arg0, %c0_i32, %c0_i32_0, %c0_i32_1 : i32, i32, i32, i32
  }
  func.func @transform_1(%arg0: i32) -> (i32, i32, i32, i32) {
    %c0_i32 = arith.constant 0 : i32
    %c0_i32_0 = arith.constant 0 : i32
    %c0_i32_1 = arith.constant 0 : i32
    %c0_i32_2 = arith.constant 0 : i32
    return %arg0, %c0_i32, %c0_i32_0, %c0_i32_1 : i32, i32, i32, i32
  }
  func.func @transform_2(%arg0: i32) -> (i32, i32, i32, i32) {
    %c0_i32 = arith.constant 0 : i32
    %c0_i32_0 = arith.constant 0 : i32
    %c0_i32_1 = arith.constant 0 : i32
    %c0_i32_2 = arith.constant 0 : i32
    return %arg0, %c0_i32, %c0_i32_0, %c0_i32_1 : i32, i32, i32, i32
  }
  func.func @transform_3(%arg0: i32) -> (i32, i32, i32, i32) {
    %c0_i32 = arith.constant 0 : i32
    %c0_i32_0 = arith.constant 0 : i32
    %c0_i32_1 = arith.constant 0 : i32
    %c0_i32_2 = arith.constant 0 : i32
    return %arg0, %c0_i32, %c0_i32_0, %c0_i32_1 : i32, i32, i32, i32
  }
}

module attributes {stable_mosaic.version = 11 : i64} {
  func.func @_dense_residual_kernel(%arg0: i32, %arg1: memref<16x64xf32, #tpu.memory_space<vmem>>, %arg2: memref<64x64xf32, #tpu.memory_space<vmem>>, %arg3: memref<1x64xf32, #tpu.memory_space<vmem>>, %arg4: memref<16x64xf32, #tpu.memory_space<vmem>>, %arg5: memref<16x64xf32, #tpu.memory_space<vmem>>) attributes {dimension_semantics = [#tpu.dimension_semantics<parallel>], iteration_bounds = array<i64: 1>, scalar_prefetch = 0 : i64, scratch_operands = 0 : i64, tpu.core_type = #tpu.core_type<tc>, window_params = [{transform_indices = @transform_0, window_bounds = array<i64: 16, 64>}, {pipeline_mode = #tpu.pipeline_mode<synchronous>, transform_indices = @transform_1, window_bounds = array<i64: 64, 64>}, {pipeline_mode = #tpu.pipeline_mode<synchronous>, transform_indices = @transform_2, window_bounds = array<i64: 1, 64>}, {transform_indices = @transform_3, window_bounds = array<i64: 16, 64>}, {transform_indices = @transform_4, window_bounds = array<i64: 16, 64>}]} {
    %c0 = arith.constant 0 : index
    %c0_0 = arith.constant 0 : index
    %0 = vector.load %arg4[%c0, %c0_0] : memref<16x64xf32, #tpu.memory_space<vmem>>, vector<16x64xf32>
    %c0_1 = arith.constant 0 : index
    %c0_2 = arith.constant 0 : index
    %1 = vector.load %arg1[%c0_1, %c0_2] : memref<16x64xf32, #tpu.memory_space<vmem>>, vector<16x64xf32>
    %c0_3 = arith.constant 0 : index
    %c0_4 = arith.constant 0 : index
    %2 = vector.load %arg2[%c0_3, %c0_4] : memref<64x64xf32, #tpu.memory_space<vmem>>, vector<64x64xf32>
    %cst = arith.constant dense<0.000000e+00> : vector<16x64xf32>
    %3 = tpu.matmul %1, %2, %cst {dimension_numbers = #tpu.dot_dimension_numbers<[1], [0], [0], [1], [0, 0, 1, 1], [], []>} : vector<16x64xf32>, vector<64x64xf32>, vector<16x64xf32> -> vector<16x64xf32>
    %4 = arith.addf %0, %3 : vector<16x64xf32>
    %c0_5 = arith.constant 0 : index
    %c0_6 = arith.constant 0 : index
    %5 = vector.load %arg3[%c0_5, %c0_6] : memref<1x64xf32, #tpu.memory_space<vmem>>, vector<1x64xf32>
    %6 = vector.broadcast %5 : vector<1x64xf32> to vector<16x64xf32>
    %7 = arith.addf %4, %6 : vector<16x64xf32>
    %c0_7 = arith.constant 0 : index
    %c0_8 = arith.constant 0 : index
    %8 = vector.load %arg5[%c0_7, %c0_8] : memref<16x64xf32, #tpu.memory_space<vmem>>, vector<16x64xf32>
    tpu.vector_store %arg5[%c0_7, %c0_8], %7 {strides = array<i32>} : memref<16x64xf32, #tpu.memory_space<vmem>>, vector<16x64xf32>,
    return
  }
  func.func @transform_0(%arg0: i32) -> (i32, i32) {
    %c0_i32 = arith.constant 0 : i32
    %c0_i32_0 = arith.constant 0 : i32
    return %arg0, %c0_i32 : i32, i32
  }
  func.func @transform_1(%arg0: i32) -> (i32, i32) {
    %c0_i32 = arith.constant 0 : i32
    %c0_i32_0 = arith.constant 0 : i32
    %c0_i32_1 = arith.constant 0 : i32
    return %c0_i32, %c0_i32_0 : i32, i32
  }
  func.func @transform_2(%arg0: i32) -> (i32, i32) {
    %c0_i32 = arith.constant 0 : i32
    %c0_i32_0 = arith.constant 0 : i32
    %c0_i32_1 = arith.constant 0 : i32
    return %c0_i32, %c0_i32_0 : i32, i32
  }
  func.func @transform_3(%arg0: i32) -> (i32, i32) {
    %c0_i32 = arith.constant 0 : i32
    %c0_i32_0 = arith.constant 0 : i32
    return %arg0, %c0_i32 : i32, i32
  }
  func.func @transform_4(%arg0: i32) -> (i32, i32) {
    %c0_i32 = arith.constant 0 : i32
    %c0_i32_0 = arith.constant 0 : i32
    return %arg0, %c0_i32 : i32, i32
  }
}

</mosaic_0001>

<bundles_post_ra>
// kernel: encoder_gru_forward.9
= control target key start
LH: loop header
LB: loop body
LE: loop exit
PB: predicated region body
PF: predicated region fallthrough
CT: control target
= control target key end

     0   :  { %s780_s18 = smov 0   ;;  %s782_s19 = smov 0   ;;  %s840_s0 = inlined_call_operand.vmem [shape: f32[16,32], index: 0, kind: input, shape index: {}]   ;;  %s841_s1 = inlined_call_operand.vmem [shape: f32[16,32], index: 1, kind: input, shape index: {}]   ;;  %s842_s2 = inlined_call_operand.vmem [shape: f32[2,32,96], index: 2, kind: input, shape index: {}]   ;;  %s843_s3 = inlined_call_operand.vmem [shape: f32[2,32,96], index: 3, kind: input, shape index: {}]   ;;  %s844_s4 = inlined_call_operand.vmem [shape: f32[2,1,96], index: 4, kind: input, shape index: {}]   ;;  %s845_s5 = inlined_call_operand.vmem [shape: f32[2,16,96], index: 5, kind: output, shape index: {}]  }
   0x1   :  { %s784_s20 = smov 0  }
   0x2 LB: > { %s27_s21 = sadd.s32 1, %s744_s19  ;;  %p651_p0 = scmp.ge.s32.totalorder %s748_s20, 1  ;;  %s748_s20 = sphi %s784_s20, %s15_s20   ;;  %s744_s19 = sphi %s782_s19, %s847_s19   ;;  %s740_s18 = sphi %s780_s18, %s846_s18  }
   0x3   : > { %p29_p1 = scmp.ge.s32.totalorder %s27_s21, 2  ;;  %p241_p2 = scmp.lt.s32.totalorder %s748_s20, 3 }
   0x5   : > { %s849_s21 = smov (%p29_p1, %s27_s21), 0  ;;  %p242_p3 = pnand %p651_p0, %p241_p2 }
   0x6   : > { %p303_p4 = scmp.lt.s32.totalorder (!%p242_p3), %s740_s18, 1 }
   0x7   : > { %245 = sbr.rel (%p242_p3) target bundleno = 225 (0xe1), region = 40 }
   0xc   : > { %v332_v0 = vld [vmem:[%s841_s1] sm:$0xff]  ;;  %vm338_vm0 = vcmask 261120   ;;  %s851_s18 = smov (!%p303_p4, %s740_s18), 1  ;;  %v333_v10 = vld [vmem:[%s841_s1 + $0x8] sm:$0xff]  ;;  %vm510_vm1 = vcmask 785408  }
   0xd   : > { %v326_v1 = vld [vmem:[%s840_s0] sm:$0xff]  ;;  %688 = vmatprep.mubr.msk.f32.mxu0 %vm338_vm0, %v332_v0  ;;  %s665_s26 = sshll.u32 %s851_s18, 5  ;;  %v327_v11 = vld [vmem:[%s840_s0 + $0x8] sm:$0xff]  ;;  %s315_s14 = scalar_lea.vmem %s844_s4, %s851_s18 }
   0xe   : > { %699 = vmatprep.mubr.msk.f32.mxu1 %vm338_vm0, %v326_v1  ;;  %s312_s29 = scalar_lea.vmem %s843_s3, %s665_s26  ;;  %s307_s7 = scalar_lea.vmem %s842_s2, %s665_s26  ;;  %v662_v14 = vld [vmem:[%s315_s14] ss:$0 sm:$0xff] }
   0xf   : > { %v337_v2 = vld [vmem:[%s312_s29 + $0x18] sm:$0xff]  ;;  %v336_v4 = vld [vmem:[%s312_s29 + $0x10] sm:$0xff]  ;;  %v335_v6 = vld [vmem:[%s312_s29 + $0x8] sm:$0xff]  ;;  %s667_s15 = sshll.u32 %s851_s18, 4 }
  0x10   : > { %v331_v3 = vld [vmem:[%s307_s7 + $0x18] sm:$0xff]  ;;  %680 = vmatprep.subr.mxu0 %v337_v2  ;;  %v330_v5 = vld [vmem:[%s307_s7 + $0x10] sm:$0xff]  ;;  %v329_v7 = vld [vmem:[%s307_s7 + $0x8] sm:$0xff]  ;;  %s324_s22 = scalar_lea.vmem %s845_s5, %s667_s15 }
  0x11   : > { %691 = vmatprep.subr.mxu1 %v331_v3  ;;  %681 = vmatpush3.msra.mxu0 %v337_v2  ;;  %v334_v8 = vld [vmem:[%s312_s29] sm:$0xff] }
  0x12   : > { %692 = vmatpush3.msra.mxu1 %v331_v3  ;;  %682 = vmatprep.subr.mxu0 %v336_v4  ;;  %v328_v9 = vld [vmem:[%s307_s7] sm:$0xff] }
  0x13   : > { %693 = vmatprep.subr.mxu1 %v330_v5  ;;  %683 = vmatpush3.msra.mxu0 %v336_v4 }
  0x14   : > { %694 = vmatpush3.msra.mxu1 %v330_v5  ;;  %684 = vmatprep.subr.mxu0 %v335_v6 }
  0x15   : > { %695 = vmatprep.subr.mxu1 %v329_v7  ;;  %685 = vmatpush3.msra.mxu0 %v335_v6 }
  0x16   : > { %696 = vmatpush3.msra.mxu1 %v329_v7  ;;  %686 = vmatprep.subr.mxu0 %v334_v8 }
  0x17   : > { %697 = vmatprep.subr.mxu1 %v328_v9  ;;  %687 = vmatpush3.msra.mxu0 %v334_v8 }
  0x18   : > { %698 = vmatpush3.msra.mxu1 %v328_v9  ;;  %689 = vmatmul.mubr.msk.f32.vlgmr.msra.gmra.mxu0 %vm338_vm0, %v333_v10 }
  0x19   : > { %700 = vmatmul.mubr.msk.f32.vlgmr.msra.gmra.mxu1 %vm338_vm0, %v327_v11 }
  0xd8   : > { %v690_v12 = vpop.f32.mrf.mxu0 }
  0xd9   : > { %v701_v13 = vpop.f32.mrf.mxu1 }
  0xda   : > { %v498_v15 = vadd.f32 %v701_v13, %v690_v12  ;;  %v411_v16 = vpop.f32.mrf.mxu0 }
  0xdb   : > { %v492_v17 = vpop.f32.mrf.mxu1 }
  0xdc   : > { %v509_v18 = vadd.f32 %v662_v14, %v498_v15  ;;  %v493_v19 = vadd.f32 %v492_v17, %v411_v16 }
  0xde   : > { %512 = vst.msk [vmem:[%s324_s22 + $0x8] sm:$0xff] %vm510_vm1, %v509_v18  ;;  %v508_v20 = vadd.f32 %v662_v14, %v493_v19 }
  0xe0   : > { %511 = vst.msk [vmem:[%s324_s22] sm:$0xff] %vm510_vm1, %v508_v20 }
  0xe1 PF: > { %s15_s20 = sadd.s32 1, %s748_s20   ;;  %s846_s18 = smov %s744_s19 }
  0xe2   : > { %p12_p5 = scmp.ge.s32.totalorder %s15_s20, 4   ;;  %s847_s19 = smov %s849_s21 }
  0xe4   :  { %14 = sbr.rel (!%p12_p5) target bundleno = 2 (0x2), region = 82 }

// kernel: encoder_gru_forward.7
= control target key start
LH: loop header
LB: loop body
LE: loop exit
PB: predicated region body
PF: predicated region fallthrough
CT: control target
= control target key end

     0   :  { %s535_s12 = smov 0   ;;  %s537_s13 = smov 0   ;;  %s579_s0 = inlined_call_operand.vmem [shape: f32[16,32], index: 0, kind: input, shape index: {}]   ;;  %s580_s1 = inlined_call_operand.vmem [shape: f32[2,32,96], index: 1, kind: input, shape index: {}]   ;;  %s581_s2 = inlined_call_operand.vmem [shape: f32[2,1,96], index: 2, kind: input, shape index: {}]   ;;  %s582_s3 = inlined_call_operand.vmem [shape: f32[2,16,96], index: 3, kind: output, shape index: {}]  }
   0x1   :  { %s539_s14 = smov 0  }
   0x2 LB: > { %s25_s15 = sadd.s32 1, %s509_s13  ;;  %p438_p0 = scmp.ge.s32.totalorder %s513_s14, 1  ;;  %s513_s14 = sphi %s539_s14, %s13_s14   ;;  %s509_s13 = sphi %s537_s13, %s584_s13   ;;  %s505_s12 = sphi %s535_s12, %s583_s12  }
   0x3   : > { %p27_p1 = scmp.ge.s32.totalorder %s25_s15, 2  ;;  %p170_p2 = scmp.lt.s32.totalorder %s513_s14, 3 }
   0x5   : > { %s586_s15 = smov (%p27_p1, %s25_s15), 0  ;;  %p171_p3 = pnand %p438_p0, %p170_p2 }
   0x6   : > { %p212_p4 = scmp.lt.s32.totalorder (!%p171_p3), %s505_s12, 1 }
   0x7   : > { %174 = sbr.rel (%p171_p3) target bundleno = 222 (0xde), region = 32 }
   0xc   : > { %v230_v0 = vld [vmem:[%s579_s0] sm:$0xff]  ;;  %vm243_vm0 = vcmask 261120   ;;  %s588_s12 = smov (!%p212_p4, %s505_s12), 1  ;;  %v231_v5 = vld [vmem:[%s579_s0 + $0x8] sm:$0xff]  ;;  %vm325_vm1 = vcmask 785408  }
   0xd   : > { %464 = vmatprep.mubr.msk.f32.mxu0 %vm243_vm0, %v230_v0  ;;  %s448_s18 = sshll.u32 %s588_s12, 5  ;;  %s219_s26 = scalar_lea.vmem %s581_s2, %s588_s12 }
   0xe   : > { %s216_s21 = scalar_lea.vmem %s580_s1, %s448_s18  ;;  %s449_s27 = sshll.u32 %s588_s12, 4  ;;  %v443_v6 = vld [vmem:[%s219_s26] ss:$0 sm:$0xff] }
   0xf   : > { %v235_v1 = vld [vmem:[%s216_s21 + $0x18] sm:$0xff]  ;;  %v234_v2 = vld [vmem:[%s216_s21 + $0x10] sm:$0xff]  ;;  %v233_v3 = vld [vmem:[%s216_s21 + $0x8] sm:$0xff]  ;;  %s228_s30 = scalar_lea.vmem %s582_s3, %s449_s27 }
  0x10   : > { %456 = vmatprep.subr.mxu0 %v235_v1  ;;  %v232_v4 = vld [vmem:[%s216_s21] sm:$0xff] }
  0x11   : > { %457 = vmatpush3.msra.mxu0 %v235_v1 }
  0x12   : > { %458 = vmatprep.subr.mxu0 %v234_v2 }
  0x13   : > { %459 = vmatpush3.msra.mxu0 %v234_v2 }
  0x14   : > { %460 = vmatprep.subr.mxu0 %v233_v3 }
  0x15   : > { %461 = vmatpush3.msra.mxu0 %v233_v3 }
  0x16   : > { %462 = vmatprep.subr.mxu0 %v232_v4 }
  0x17   : > { %463 = vmatpush3.msra.mxu0 %v232_v4 }
  0x18   : > { %465 = vmatmul.mubr.msk.f32.vlgmr.msra.gmra.mxu0 %vm243_vm0, %v231_v5 }
  0xd8   : > { %v466_v7 = vpop.f32.mrf.mxu0 }
  0xd9   : > { %v322_v8 = vadd.f32 %v466_v7, %v443_v6 }
  0xda   : > { %v316_v9 = vpop.f32.mrf.mxu0 }
  0xdb   : > { %327 = vst.msk [vmem:[%s228_s30 + $0x8] sm:$0xff] %vm325_vm1, %v322_v8  ;;  %v317_v10 = vadd.f32 %v443_v6, %v316_v9 }
  0xdd   : > { %326 = vst.msk [vmem:[%s228_s30] sm:$0xff] %vm325_vm1, %v317_v10 }
  0xde PF: > { %s13_s14 = sadd.s32 1, %s513_s14   ;;  %s583_s12 = smov %s509_s13 }
  0xdf   : > { %p10_p5 = scmp.ge.s32.totalorder %s13_s14, 4   ;;  %s584_s13 = smov %s586_s15 }
  0xe1   :  { %12 = sbr.rel (!%p10_p5) target bundleno = 2 (0x2), region = 68 }

// kernel: encoder_gru_forward.11
= control target key start
LH: loop header
LB: loop body
LE: loop exit
PB: predicated region body
PF: predicated region fallthrough
CT: control target
= control target key end

     0   :  { %v155_v3 = vmov 0.0   ;;  %vm44_vm0 = vcmask 523264   ;;  %v34_v19 = vlaneseq  ;;  %s249_s1 = inlined_call_operand.vmem [shape: f32[64,192], index: 1, kind: input, shape index: {}]   ;;  %s250_s0 = inlined_call_operand.vmem [shape: f32[16,64], index: 0, kind: input, shape index: {}]   ;;  %s251_s2 = inlined_call_operand.vmem [shape: f32[1,192], index: 2, kind: input, shape index: {}]   ;;  %s252_s3 = inlined_call_operand.vmem [shape: f32[16,192], index: 3, kind: output, shape index: {}]  }
   0x1   :  { %v31_v0 = vld [vmem:[%s249_s1 + $0x78] sm:$0xff]  ;;  %v30_v1 = vld [vmem:[%s249_s1 + $0x70] sm:$0xff]  ;;  %v29_v2 = vld [vmem:[%s249_s1 + $0x68] sm:$0xff]  ;;  %115 = vmatprep.mubr.f32.mxu0 %v155_v3  ;;  %121 = vmatprep.mubr.f32.mxu1 %v155_v3 }
   0x2   :  { %67 = vmatprep.subr.mxu0 %v31_v0  ;;  %138 = vmatprep.subr.mxu1 %v31_v0  ;;  %v28_v4 = vld [vmem:[%s249_s1 + $0x60] sm:$0xff]  ;;  %v27_v5 = vld [vmem:[%s249_s1 + $0x58] sm:$0xff]  ;;  %v26_v6 = vld [vmem:[%s249_s1 + $0x50] sm:$0xff]  ;;  %v35_v20 = vshrl.u32 %v34_v19, 7 }
   0x3   :  { %68 = vmatpush1.msra.mxu0 %v30_v1  ;;  %146 = vmatpush1.msra.mxu1 %v30_v1  ;;  %v25_v7 = vld [vmem:[%s249_s1 + $0x48] sm:$0xff]  ;;  %v24_v8 = vld [vmem:[%s249_s1 + $0x40] sm:$0xff]  ;;  %v23_v9 = vld [vmem:[%s249_s1 + $0x38] sm:$0xff] }
   0x4   :  { %69 = vmatprep.subr.mxu0 %v29_v2  ;;  %139 = vmatprep.subr.mxu1 %v29_v2  ;;  %v22_v10 = vld [vmem:[%s249_s1 + $0x30] sm:$0xff]  ;;  %v21_v11 = vld [vmem:[%s249_s1 + $0x28] sm:$0xff]  ;;  %v20_v12 = vld [vmem:[%s249_s1 + $0x20] sm:$0xff]  ;;  %v36_v21 = vsub.s32 0, %v35_v20  ;;  %v40_v23 = vsub.s32 1, %v35_v20 }
   0x5   :  { %70 = vmatpush1.msra.mxu0 %v28_v4  ;;  %147 = vmatpush1.msra.mxu1 %v28_v4  ;;  %v19_v13 = vld [vmem:[%s249_s1 + $0x18] sm:$0xff]  ;;  %v18_v14 = vld [vmem:[%s249_s1 + $0x10] sm:$0xff]  ;;  %v17_v15 = vld [vmem:[%s249_s1 + $0x8] sm:$0xff] }
   0x6   :  { %71 = vmatprep.subr.mxu0 %v27_v5  ;;  %140 = vmatprep.subr.mxu1 %v27_v5  ;;  %v16_v16 = vld [vmem:[%s249_s1] sm:$0xff]  ;;  %v15_v18 = vld [vmem:[%s250_s0 + $0x8] sm:$0xff] }
   0x7   :  { %72 = vmatpush1.msra.mxu0 %v26_v6  ;;  %148 = vmatpush1.msra.mxu1 %v26_v6  ;;  %v14_v17 = vld [vmem:[%s250_s0] sm:$0xff] }
   0x8   :  { %73 = vmatprep.subr.mxu0 %v25_v7  ;;  %141 = vmatprep.subr.mxu1 %v25_v7  ;;  %v32_v22 = vld [vmem:[%s251_s2] sm:$0x3] }
   0x9   :  { %74 = vmatpush1.msra.mxu0 %v24_v8  ;;  %149 = vmatpush1.msra.mxu1 %v24_v8  ;;  %v37_v24 = vrot.slane %v32_v22, %v36_v21  ;;  %v41_v25 = vrot.slane %v32_v22, %v40_v23 }
   0xa   :  { %75 = vmatprep.subr.mxu0 %v23_v9  ;;  %142 = vmatprep.subr.mxu1 %v23_v9 }
   0xb   :  { %76 = vmatpush1.msra.mxu0 %v22_v10  ;;  %150 = vmatpush1.msra.mxu1 %v22_v10 }
   0xc   :  { %77 = vmatprep.subr.mxu0 %v21_v11  ;;  %143 = vmatprep.subr.mxu1 %v21_v11 }
   0xd   :  { %78 = vmatpush1.msra.mxu0 %v20_v12  ;;  %151 = vmatpush1.msra.mxu1 %v20_v12 }
   0xe   :  { %79 = vmatprep.subr.mxu0 %v19_v13  ;;  %144 = vmatprep.subr.mxu1 %v19_v13 }
   0xf   :  { %80 = vmatpush1.msra.mxu0 %v18_v14  ;;  %152 = vmatpush1.msra.mxu1 %v18_v14 }
  0x10   :  { %81 = vmatprep.subr.mxu0 %v17_v15  ;;  %145 = vmatprep.subr.mxu1 %v17_v15 }
  0x11   :  { %82 = vmatpush1.msra.mxu0 %v16_v16  ;;  %153 = vmatpush1.msra.mxu1 %v16_v16 }
  0x12   :  { %136 = vmatmul.mubr.msk.f32.vlgmr.msra.gmra.mxu0 %vm44_vm0, %v14_v17  ;;  %137 = vmatmul.mubr.msk.f32.vlgmr.msra.gmra.mxu1 %vm44_vm0, %v15_v18 }
  0xd2   :  { %v117_v26 = vpop.f32.mrf.mxu0  ;;  %v123_v27 = vpop.f32.mrf.mxu1 }
  0xd3   :  { %v118_v28 = vadd.f32 %v117_v26, %v37_v24  ;;  %v124_v29 = vadd.f32 %v123_v27, %v37_v24 }
  0xd4   :  { %v119_v30 = vpop.f32.mrf.mxu0  ;;  %v125_v31 = vpop.f32.mrf.mxu1 }
  0xd5   :  { %128 = vst [vmem:[%s252_s3] sm:$0xff] %v118_v28  ;;  %130 = vst [vmem:[%s252_s3 + $0x10] sm:$0xff] %v124_v29  ;;  %v120_v32 = vadd.f32 %v119_v30, %v41_v25  ;;  %v126_v33 = vadd.f32 %v125_v31, %v41_v25 }
  0xd7   :  { %129 = vst.msk [vmem:[%s252_s3 + $0x8] sm:$0xff] %vm44_vm0, %v120_v32  ;;  %131 = vst.msk [vmem:[%s252_s3 + $0x18] sm:$0xff] %vm44_vm0, %v126_v33 }

// kernel: encoder_gru_forward.8
= control target key start
LH: loop header
LB: loop body
LE: loop exit
PB: predicated region body
PF: predicated region fallthrough
CT: control target
= control target key end

     0   :  { %s1801_s15 = smov 0   ;;  %s1803_s16 = smov 0   ;;  %s2058_s0 = inlined_call_operand.vmem [shape: f32[2,8,2,96], index: 0, kind: input, shape index: {}]   ;;  %s2059_s1 = inlined_call_operand.vmem [shape: f32[2,32,96], index: 1, kind: input, shape index: {}]   ;;  %s2060_s2 = inlined_call_operand.vmem [shape: f32[2,1,32], index: 2, kind: input, shape index: {}]   ;;  %s2061_s3 = inlined_call_operand.vmem [shape: f32[2,8,2,32], index: 3, kind: output, shape index: {0}]   ;;  %s2062_s4 = inlined_call_operand.vmem [shape: f32[2,2,32], index: 4, kind: output, shape index: {1}]  }
   0x1   :  { %s1805_s17 = smov 0  }
   0x2 LB: > { %s27_s18 = sadd.s32 1, %s1765_s16  ;;  %p1500_p0 = scmp.ge.s32.totalorder %s1769_s17, 1  ;;  %s1769_s17 = sphi %s1805_s17, %s15_s17   ;;  %s1765_s16 = sphi %s1803_s16, %s2064_s16   ;;  %s1761_s15 = sphi %s1801_s15, %s2063_s15  }
   0x3   : > { %p29_p1 = scmp.ge.s32.totalorder %s27_s18, 2  ;;  %p234_p2 = scmp.lt.s32.totalorder %s1769_s17, 3 }
   0x5   : > { %s2066_s18 = smov (%p29_p1, %s27_s18), 0  ;;  %p235_p3 = pnand %p1500_p0, %p234_p2 }
   0x6   : > { %p296_p4 = scmp.lt.s32.totalorder (!%p235_p3), %s1761_s15, 1  ;;  %s1773_s27 = smov (!%p235_p3), 64  }
   0x7   : > { %238 = sbr.rel (%p235_p3) target bundleno = 6493 (0x195d), region = 32  ;;  %s1774_s8 = smov (!%p235_p3), 32  }
   0x8   : > { %s1509_s29 = smul.u32 (!%p235_p3), 14, %s1761_s15  ;;  %s1924_s14 = ssub.s32 (!%p235_p3), 1, %s1761_s15 }
   0x9   : > { %s482_s13 = smul.u32 (!%p235_p3), 6, %s1761_s15  ;;  %s1519_s9 = sshll.u32 (!%p235_p3), %s1761_s15, 2 }
   0xa   : > { %s596_s25 = smul.u32 (!%p235_p3), 5, %s1761_s15 }
   0xc   : > { %vm346_vm0 = vcmask 254976   ;;  %v1771_v0 = vmov 0.0   ;;  %vm1772_vm1 = vmmov 0   ;;  %s1828_s19 = scalar_select %p296_p4, %s1761_s15, 1  ;;  %vm363_vm2 = vcmask 261120  }
   0xd   : > { %1582 = vmatprep.subr.mxu0 %v1771_v0  ;;  %1590 = vmatprep.mubr.msk.f32.mxu0 %vm1772_vm1, %v1771_v0  ;;  %347 = vst.msk [vmem:[#allocation2] sm:$0x3] %vm346_vm0, %v1771_v0 }
   0xe   : > { %1593 = vmatprep.subr.mxu1 %v1771_v0  ;;  %1601 = vmatprep.mubr.msk.f32.mxu1 %vm1772_vm1, %v1771_v0  ;;  %s1540_s20 = sshll.u32 %s1828_s19, 5  ;;  %s317_s23 = scalar_lea.vmem %s2060_s2, %s1828_s19 }
   0xf   : > { %s314_s26 = scalar_lea.vmem %s2059_s1, %s1540_s20  ;;  %v1508_v1 = vld [vmem:[%s317_s23] ss:$0 sm:$0xff]  ;;  %s1539_s28 = sshll.u32 %s1828_s19, 4 }
  0x10   : > { %v1841_v2 = vld [vmem:[%s314_s26 + $0x18] sm:$0xff]  ;;  %v1843_v3 = vld [vmem:[%s314_s26 + $0x10] sm:$0xff]  ;;  %444 = vrot.lane.b32.xlu0 %v1508_v1, %s1773_s27  ;;  %v1849_v4 = vld [vmem:[%s314_s26 + $0x8] sm:$0xff]  ;;  %s1888_s6 = scalar_lea.vmem %s2058_s0, %s1539_s28  ;;  %s1903_s11 = scalar_lea.vmem %s2061_s3, %s1539_s28 }
  0x11   : > { %1583 = vmatpush3.msra.mxu0 %v1841_v2  ;;  %1594 = vmatpush3.msra.mxu1 %v1841_v2  ;;  %v1855_v5 = vld [vmem:[%s314_s26] sm:$0xff]  ;;  %s361_s7 = scalar_lea.vmem %s1888_s6, %s1509_s29  ;;  %s478_s12 = scalar_lea.vmem %s1903_s11, %s1509_s29 }
  0x12   : > { %1584 = vmatprep.subr.mxu0 %v1771_v0  ;;  %1595 = vmatprep.subr.mxu1 %v1771_v0  ;;  %v362_v11 = vld [vmem:[%s361_s7] sm:$0x3]  ;;  %s483_s20 = sadd.s32 %s482_s13, %s1924_s14  ;;  %s1775_s23 = smov 96  }
  0x13   : > { %1585 = vmatpush3.msra.mxu0 %v1843_v3  ;;  %1596 = vmatpush3.msra.mxu1 %v1843_v3  ;;  %s1512_s21 = sshll.u32 %s483_s20, 1  ;;  %s1515_s26 = sshll.u32 %s1924_s14, 1 }
  0x14   : > { %1586 = vmatprep.subr.mxu0 %v1771_v0  ;;  %1597 = vmatprep.subr.mxu1 %v1771_v0  ;;  %v358_v6 = vld [vmem:[#allocation2] sm:$0x3]  ;;  %s485_s22 = scalar_lea.vmem %s1888_s6, %s1512_s21  ;;  %s593_s24 = scalar_lea.vmem %s1903_s11, %s1512_s21 }
  0x15   : > { %1587 = vmatpush3.msra.mxu0 %v1849_v4  ;;  %1598 = vmatpush3.msra.mxu1 %v1849_v4  ;;  %v486_v32 = vld [vmem:[%s485_s22] sm:$0x3]  ;;  %s597_s28 = sadd.s32 %s1515_s26, %s596_s25  ;;  %s709_s7 = smul.u32 3, %s1924_s14 }
  0x16   : > { %1588 = vmatprep.subr.mxu0 %v1771_v0  ;;  %1599 = vmatprep.subr.mxu1 %v1771_v0  ;;  %s1516_s29 = sshll.u32 %s597_s28, 1  ;;  %s824_s21 = smul.u32 3, %s1761_s15 }
  0x17   : > { %1589 = vmatpush3.msra.mxu0 %v1855_v5  ;;  %1600 = vmatpush3.msra.mxu1 %v1855_v5  ;;  %s599_s30 = scalar_lea.vmem %s1888_s6, %s1516_s29  ;;  %s707_s5 = scalar_lea.vmem %s1903_s11, %s1516_s29 }
  0x18   : > { %1591 = vmatmul.mubr.msk.f32.vlgmr.msra.gmra.mxu0 %vm363_vm2, %v358_v6  ;;  %1604 = vmatprep.subr.mxu0 %v1771_v0  ;;  %v600_v52 = vld [vmem:[%s599_s30] sm:$0x3]  ;;  %s711_s10 = sadd.s32 %s1519_s9, %s709_s7  ;;  %s1523_s22 = sshll.u32 %s1924_s14, 2 }
  0x19   : > { %1605 = vmatpush3.msra.mxu0 %v1841_v2  ;;  %1612 = vmatprep.mubr.msk.f32.mxu0 %vm1772_vm1, %v1771_v0  ;;  %s937_s29 = smul.u32 5, %s1924_s14  ;;  %s1527_s30 = sshll.u32 %s1761_s15, 1 }
  0x1a   : > { %1606 = vmatprep.subr.mxu0 %v1771_v0  ;;  %1615 = vmatprep.subr.mxu1 %v1771_v0 }
  0x1b   : > { %1607 = vmatpush3.msra.mxu0 %v1843_v3 }
  0x1c   : > { %1608 = vmatprep.subr.mxu0 %v1771_v0 }
  0x1d   : > { %1609 = vmatpush3.msra.mxu0 %v1849_v4 }
  0x1e   : > { %1610 = vmatprep.subr.mxu0 %v1771_v0 }
  0x1f   : > { %1611 = vmatpush3.msra.mxu0 %v1855_v5 }
  0x20   : > { %1626 = vmatprep.subr.mxu0 %v1771_v0 }
  0x82   : > { %v1877_v7 = vpop.permute.xlu0 %444 }
  0xd8   : > { %v433_v8 = vpop.f32.mrf.mxu0 }
  0xd9   : > { %v447_v9 = vadd.f32 %v1877_v7, %v433_v8  ;;  %v437_v12 = vadd.f32 %v433_v8, %v362_v11 }
  0xda   : > { %v1592_v10 = vpop.f32.mrf.mxu0 }
  0xdb   : > { %449 = vrot.lane.b32.xlu0 %v447_v9, %s1773_s27  ;;  %v1511_v13 = vmul.f32 -1.442695, %v437_v12 }
  0xdd   : > { %1699 = vpow2.f32 %v1511_v13 }
  0xea   : > { %v1700_v14 = vpop.eup %1699 }
  0xeb   : > { %v441_v15 = vadd.f32 1.0, %v1700_v14 }
  0xed   : > { %1701 = vrcp.f32 %v441_v15 }
  0xfa   : > { %v1702_v16 = vpop.eup %1701 }
 0x14d   : > { %v450_v17 = vpop.permute.xlu0 %449 }
 0x14e   : > { %v452_v18 = vmul.f32 %v1702_v16, %v450_v17 }
 0x150   : > { %454 = vrot.lane.b32.xlu1 %v452_v18, %s1773_s27 }
 0x1c2   : > { %v455_v19 = vpop.permute.xlu1 %454 }
 0x1c3   : > { %v457_v20 = vadd.f32 %v455_v19, %v362_v11 }
 0x1c5   : > { %1703 = vtanh.f32 %v457_v20 }
 0x1d2   : > { %v1704_v21 = vpop.eup %1703 }
 0x1d3   : > { %460 = vrot.lane.b32.xlu1 %v1704_v21, %s1773_s27 }
 0x245   : > { %v461_v22 = vpop.permute.xlu1 %460 }
 0x246   : > { %v463_v23 = vsub.f32 %v358_v6, %v461_v22 }
 0x248   : > { %465 = vrot.lane.b32.xlu0 %v463_v23, %s1774_s8 }
 0x2ba   : > { %v466_v24 = vpop.permute.xlu0 %465 }
 0x2bb   : > { %v468_v25 = vmul.f32 %v1702_v16, %v466_v24 }
 0x2bd   : > { %470 = vrot.lane.b32.xlu1 %v468_v25, %s1774_s8 }
 0x32f   : > { %v471_v26 = vpop.permute.xlu1 %470 }
 0x330   : > { %v473_v27 = vadd.f32 %v1704_v21, %v471_v26 }
 0x332   : > { %475 = vrot.lane.b32.xlu0 %v473_v27, %s1773_s27 }
 0x3a4   : > { %v476_v28 = vpop.permute.xlu0 %475 }
 0x3a5   : > { %480 = vst.msk [vmem:[%s478_s12] sm:$0x3] %vm346_vm0, %v476_v28  ;;  %1602 = vmatmul.mubr.msk.f32.vlgmr.msra.gmra.mxu1 %vm363_vm2, %v476_v28  ;;  %s1520_s12 = sshll.u32 %s711_s10, 1 }
 0x3a6   : > { %1616 = vmatpush3.msra.mxu1 %v1841_v2  ;;  %1623 = vmatprep.mubr.msk.f32.mxu1 %vm1772_vm1, %v1771_v0  ;;  %s713_s13 = scalar_lea.vmem %s1888_s6, %s1520_s12  ;;  %s821_s20 = scalar_lea.vmem %s1903_s11, %s1520_s12 }
 0x3a7   : > { %1617 = vmatprep.subr.mxu1 %v1771_v0  ;;  %v714_v14 = vld [vmem:[%s713_s13] sm:$0x3]  ;;  %s1051_s12 = smul.u32 6, %s1924_s14 }
 0x3a8   : > { %1618 = vmatpush3.msra.mxu1 %v1843_v3 }
 0x3a9   : > { %1619 = vmatprep.subr.mxu1 %v1771_v0  ;;  %s1052_s13 = sadd.s32 %s1761_s15, %s1051_s12 }
 0x3aa   : > { %1620 = vmatpush3.msra.mxu1 %v1849_v4 }
 0x3ab   : > { %1621 = vmatprep.subr.mxu1 %v1771_v0 }
 0x3ac   : > { %1622 = vmatpush3.msra.mxu1 %v1855_v5 }
 0x3ad   : > { %1637 = vmatprep.subr.mxu1 %v1771_v0 }
 0x465   : > { %v555_v29 = vpop.f32.mrf.mxu1 }
 0x466   : > { %v566_v30 = vadd.f32 %v555_v29, %v1877_v7  ;;  %v559_v33 = vadd.f32 %v555_v29, %v486_v32 }
 0x467   : > { %v1603_v31 = vpop.f32.mrf.mxu1 }
 0x468   : > { %568 = vrot.lane.b32.xlu1 %v566_v30, %s1773_s27  ;;  %v1514_v34 = vmul.f32 -1.442695, %v559_v33 }
 0x46a   : > { %1705 = vpow2.f32 %v1514_v34 }
 0x477   : > { %v1706_v35 = vpop.eup %1705 }
 0x478   : > { %v563_v36 = vadd.f32 1.0, %v1706_v35 }
 0x47a   : > { %1707 = vrcp.f32 %v563_v36 }
 0x487   : > { %v1708_v37 = vpop.eup %1707 }
 0x4da   : > { %v569_v38 = vpop.permute.xlu1 %568 }
 0x4db   : > { %v571_v39 = vmul.f32 %v1708_v37, %v569_v38 }
 0x4dd   : > { %573 = vrot.lane.b32.xlu0 %v571_v39, %s1773_s27 }
 0x54f   : > { %v574_v40 = vpop.permute.xlu0 %573 }
 0x550   : > { %v576_v41 = vadd.f32 %v574_v40, %v486_v32 }
 0x552   : > { %1709 = vtanh.f32 %v576_v41 }
 0x55f   : > { %v1710_v42 = vpop.eup %1709 }
 0x560   : > { %v578_v43 = vsub.f32 %v473_v27, %v1710_v42 }
 0x562   : > { %580 = vrot.lane.b32.xlu1 %v578_v43, %s1775_s23 }
 0x5d4   : > { %v581_v44 = vpop.permute.xlu1 %580 }
 0x5d5   : > { %v583_v45 = vmul.f32 %v1708_v37, %v581_v44 }
 0x5d7   : > { %585 = vrot.lane.b32.xlu0 %v583_v45, %s1774_s8 }
 0x649   : > { %v586_v46 = vpop.permute.xlu0 %585 }
 0x64a   : > { %v588_v47 = vadd.f32 %v1710_v42, %v586_v46 }
 0x64c   : > { %590 = vrot.lane.b32.xlu1 %v588_v47, %s1773_s27 }
 0x6be   : > { %v591_v48 = vpop.permute.xlu1 %590 }
 0x6bf   : > { %594 = vst.msk [vmem:[%s593_s24] sm:$0x3] %vm346_vm0, %v591_v48  ;;  %1613 = vmatmul.mubr.msk.f32.vlgmr.msra.gmra.mxu0 %vm363_vm2, %v591_v48  ;;  %s825_s24 = sadd.s32 %s1523_s22, %s824_s21  ;;  %s1534_s22 = smul.u32 14, %s1924_s14 }
 0x6c0   : > { %1627 = vmatpush3.msra.mxu0 %v1841_v2  ;;  %1634 = vmatprep.mubr.msk.f32.mxu0 %vm1772_vm1, %v1771_v0  ;;  %s1524_s25 = sshll.u32 %s825_s24, 1 }
 0x6c1   : > { %1628 = vmatprep.subr.mxu0 %v1771_v0  ;;  %s827_s26 = scalar_lea.vmem %s1888_s6, %s1524_s25  ;;  %s935_s28 = scalar_lea.vmem %s1903_s11, %s1524_s25 }
 0x6c2   : > { %1629 = vmatpush3.msra.mxu0 %v1843_v3  ;;  %v828_v34 = vld [vmem:[%s827_s26] sm:$0x3]  ;;  %s1166_s24 = scalar_lea.vmem %s1888_s6, %s1534_s22  ;;  %s1274_s14 = scalar_lea.vmem %s1903_s11, %s1534_s22 }
 0x6c3   : > { %1630 = vmatprep.subr.mxu0 %v1771_v0 }
 0x6c4   : > { %1631 = vmatpush3.msra.mxu0 %v1849_v4 }
 0x6c5   : > { %1632 = vmatprep.subr.mxu0 %v1771_v0 }
 0x6c6   : > { %1633 = vmatpush3.msra.mxu0 %v1855_v5 }
 0x6c7   : > { %1648 = vmatprep.subr.mxu0 %v1771_v0 }
 0x77f   : > { %v669_v49 = vpop.f32.mrf.mxu0 }
 0x780   : > { %v680_v50 = vadd.f32 %v669_v49, %v1877_v7  ;;  %v673_v53 = vadd.f32 %v669_v49, %v600_v52 }
 0x781   : > { %v1614_v51 = vpop.f32.mrf.mxu0 }
 0x782   : > { %682 = vrot.lane.b32.xlu0 %v680_v50, %s1773_s27  ;;  %v1518_v54 = vmul.f32 -1.442695, %v673_v53 }
 0x784   : > { %1711 = vpow2.f32 %v1518_v54 }
 0x791   : > { %v1712_v55 = vpop.eup %1711 }
 0x792   : > { %v677_v56 = vadd.f32 1.0, %v1712_v55 }
 0x794   : > { %1713 = vrcp.f32 %v677_v56 }
 0x7a1   : > { %v1714_v57 = vpop.eup %1713 }
 0x7f4   : > { %v683_v58 = vpop.permute.xlu0 %682 }
 0x7f5   : > { %v685_v59 = vmul.f32 %v1714_v57, %v683_v58 }
 0x7f7   : > { %687 = vrot.lane.b32.xlu1 %v685_v59, %s1773_s27 }
 0x869   : > { %v688_v60 = vpop.permute.xlu1 %687 }
 0x86a   : > { %v690_v61 = vadd.f32 %v688_v60, %v600_v52 }
 0x86c   : > { %1715 = vtanh.f32 %v690_v61 }
 0x879   : > { %v1716_v62 = vpop.eup %1715 }
 0x87a   : > { %v692_v63 = vsub.f32 %v588_v47, %v1716_v62 }
 0x87c   : > { %694 = vrot.lane.b32.xlu0 %v692_v63, %s1775_s23 }
 0x8ee   : > { %v695_v1 = vpop.permute.xlu0 %694 }
 0x8ef   : > { %v697_v6 = vmul.f32 %v1714_v57, %v695_v1 }
 0x8f1   : > { %699 = vrot.lane.b32.xlu1 %v697_v6, %s1774_s8 }
 0x963   : > { %v700_v8 = vpop.permute.xlu1 %699 }
 0x964   : > { %v702_v9 = vadd.f32 %v1716_v62, %v700_v8 }
 0x966   : > { %704 = vrot.lane.b32.xlu0 %v702_v9, %s1773_s27 }
 0x9d8   : > { %v705_v10 = vpop.permute.xlu0 %704 }
 0x9d9   : > { %708 = vst.msk [vmem:[%s707_s5] sm:$0x3] %vm346_vm0, %v705_v10  ;;  %1624 = vmatmul.mubr.msk.f32.vlgmr.msra.gmra.mxu1 %vm363_vm2, %v705_v10  ;;  %s939_s5 = sadd.s32 %s1527_s30, %s937_s29 }
 0x9da   : > { %1638 = vmatpush3.msra.mxu1 %v1841_v2  ;;  %1645 = vmatprep.mubr.msk.f32.mxu1 %vm1772_vm1, %v1771_v0  ;;  %s1528_s7 = sshll.u32 %s939_s5, 1 }
 0x9db   : > { %1639 = vmatprep.subr.mxu1 %v1771_v0  ;;  %s941_s9 = scalar_lea.vmem %s1888_s6, %s1528_s7  ;;  %s1049_s10 = scalar_lea.vmem %s1903_s11, %s1528_s7 }
 0x9dc   : > { %1640 = vmatpush3.msra.mxu1 %v1843_v3 }
 0x9dd   : > { %1641 = vmatprep.subr.mxu1 %v1771_v0 }
 0x9de   : > { %1642 = vmatpush3.msra.mxu1 %v1849_v4 }
 0x9df   : > { %1643 = vmatprep.subr.mxu1 %v1771_v0 }
 0x9e0   : > { %1644 = vmatpush3.msra.mxu1 %v1855_v5 }
 0x9e1   : > { %1659 = vmatprep.subr.mxu1 %v1771_v0 }
 0xa99   : > { %v783_v11 = vpop.f32.mrf.mxu1 }
 0xa9a   : > { %v794_v12 = vadd.f32 %v783_v11, %v1877_v7  ;;  %v787_v15 = vadd.f32 %v783_v11, %v714_v14 }
 0xa9b   : > { %v1625_v13 = vpop.f32.mrf.mxu1 }
 0xa9c   : > { %796 = vrot.lane.b32.xlu1 %v794_v12, %s1773_s27  ;;  %v1522_v16 = vmul.f32 -1.442695, %v787_v15 }
 0xa9e   : > { %1717 = vpow2.f32 %v1522_v16 }
 0xaab   : > { %v1718_v17 = vpop.eup %1717 }
 0xaac   : > { %v791_v18 = vadd.f32 1.0, %v1718_v17 }
 0xaae   : > { %1719 = vrcp.f32 %v791_v18 }
 0xabb   : > { %v1720_v19 = vpop.eup %1719 }
 0xb0e   : > { %v797_v20 = vpop.permute.xlu1 %796 }
 0xb0f   : > { %v799_v21 = vmul.f32 %v1720_v19, %v797_v20 }
 0xb11   : > { %801 = vrot.lane.b32.xlu0 %v799_v21, %s1773_s27 }
 0xb83   : > { %v802_v22 = vpop.permute.xlu0 %801 }
 0xb84   : > { %v804_v23 = vadd.f32 %v802_v22, %v714_v14 }
 0xb86   : > { %1721 = vtanh.f32 %v804_v23 }
 0xb93   : > { %v1722_v24 = vpop.eup %1721 }
 0xb94   : > { %v806_v25 = vsub.f32 %v702_v9, %v1722_v24 }
 0xb96   : > { %808 = vrot.lane.b32.xlu1 %v806_v25, %s1775_s23 }
 0xc08   : > { %v809_v26 = vpop.permute.xlu1 %808 }
 0xc09   : > { %v811_v27 = vmul.f32 %v1720_v19, %v809_v26 }
 0xc0b   : > { %813 = vrot.lane.b32.xlu0 %v811_v27, %s1774_s8 }
 0xc7d   : > { %v814_v28 = vpop.permute.xlu0 %813 }
 0xc7e   : > { %v816_v29 = vadd.f32 %v1722_v24, %v814_v28 }
 0xc80   : > { %818 = vrot.lane.b32.xlu1 %v816_v29, %s1773_s27 }
 0xcf2   : > { %v819_v30 = vpop.permute.xlu1 %818 }
 0xcf3   : > { %822 = vst.msk [vmem:[%s821_s20] sm:$0x3] %vm346_vm0, %v819_v30  ;;  %1635 = vmatmul.mubr.msk.f32.vlgmr.msra.gmra.mxu0 %vm363_vm2, %v819_v30  ;;  %s1531_s20 = sshll.u32 %s1052_s13, 1 }
 0xcf4   : > { %1649 = vmatpush3.msra.mxu0 %v1841_v2  ;;  %1656 = vmatprep.mubr.msk.f32.mxu0 %vm1772_vm1, %v1771_v0  ;;  %s1054_s21 = scalar_lea.vmem %s1888_s6, %s1531_s20  ;;  %s1162_s15 = scalar_lea.vmem %s1903_s11, %s1531_s20 }
 0xcf5   : > { %1650 = vmatprep.subr.mxu0 %v1771_v0  ;;  %v1055_v11 = vld [vmem:[%s1054_s21] sm:$0x3]  ;;  %s1507_s6 = sshll.u32 %s1828_s19, 1 }
 0xcf6   : > { %1651 = vmatpush3.msra.mxu0 %v1843_v3 }
 0xcf7   : > { %1652 = vmatprep.subr.mxu0 %v1771_v0 }
 0xcf8   : > { %1653 = vmatpush3.msra.mxu0 %v1849_v4 }
 0xcf9   : > { %1654 = vmatprep.subr.mxu0 %v1771_v0 }
 0xcfa   : > { %1655 = vmatpush3.msra.mxu0 %v1855_v5 }
 0xdb3   : > { %v897_v31 = vpop.f32.mrf.mxu0 }
 0xdb4   : > { %v908_v32 = vadd.f32 %v897_v31, %v1877_v7  ;;  %v901_v35 = vadd.f32 %v897_v31, %v828_v34  ;;  %v1167_v31 = vld [vmem:[%s1166_s24] sm:$0x3] }
 0xdb5   : > { %v1636_v33 = vpop.f32.mrf.mxu0 }
 0xdb6   : > { %910 = vrot.lane.b32.xlu0 %v908_v32, %s1773_s27  ;;  %v1526_v36 = vmul.f32 -1.442695, %v901_v35 }
 0xdb8   : > { %1723 = vpow2.f32 %v1526_v36 }
 0xdc5   : > { %v1724_v37 = vpop.eup %1723 }
 0xdc6   : > { %v905_v38 = vadd.f32 1.0, %v1724_v37 }
 0xdc8   : > { %1725 = vrcp.f32 %v905_v38 }
 0xdd5   : > { %v1726_v39 = vpop.eup %1725 }
 0xe28   : > { %v911_v40 = vpop.permute.xlu0 %910 }
 0xe29   : > { %v913_v41 = vmul.f32 %v1726_v39, %v911_v40 }
 0xe2b   : > { %915 = vrot.lane.b32.xlu1 %v913_v41, %s1773_s27 }
 0xe9d   : > { %v916_v42 = vpop.permute.xlu1 %915 }
 0xe9e   : > { %v918_v43 = vadd.f32 %v916_v42, %v828_v34 }
 0xea0   : > { %1727 = vtanh.f32 %v918_v43 }
 0xead   : > { %v1728_v44 = vpop.eup %1727 }
 0xeae   : > { %v920_v45 = vsub.f32 %v816_v29, %v1728_v44 }
 0xeb0   : > { %922 = vrot.lane.b32.xlu0 %v920_v45, %s1775_s23 }
 0xf22   : > { %v923_v46 = vpop.permute.xlu0 %922 }
 0xf23   : > { %v925_v47 = vmul.f32 %v1726_v39, %v923_v46 }
 0xf25   : > { %927 = vrot.lane.b32.xlu1 %v925_v47, %s1774_s8 }
 0xf97   : > { %v928_v48 = vpop.permute.xlu1 %927 }
 0xf98   : > { %v930_v49 = vadd.f32 %v1728_v44, %v928_v48 }
 0xf9a   : > { %932 = vrot.lane.b32.xlu0 %v930_v49, %s1773_s27 }
0x100c   : > { %v933_v50 = vpop.permute.xlu0 %932 }
0x100d   : > { %936 = vst.msk [vmem:[%s935_s28] sm:$0x3] %vm346_vm0, %v933_v50  ;;  %1646 = vmatmul.mubr.msk.f32.vlgmr.msra.gmra.mxu1 %vm363_vm2, %v933_v50  ;;  %s341_s28 = scalar_lea.vmem %s2062_s4, %s1507_s6 }
0x100e   : > { %1660 = vmatpush3.msra.mxu1 %v1841_v2  ;;  %1667 = vmatprep.mubr.msk.f32.mxu1 %vm1772_vm1, %v1771_v0 }
0x100f   : > { %1661 = vmatprep.subr.mxu1 %v1771_v0 }
0x1010   : > { %1662 = vmatpush3.msra.mxu1 %v1843_v3  ;;  %v942_v3 = vld [vmem:[%s941_s9] sm:$0x3] }
0x1011   : > { %1663 = vmatprep.subr.mxu1 %v1771_v0 }
0x1012   : > { %1664 = vmatpush3.msra.mxu1 %v1849_v4 }
0x1013   : > { %1665 = vmatprep.subr.mxu1 %v1771_v0 }
0x1014   : > { %1666 = vmatpush3.msra.mxu1 %v1855_v5 }
0x10cd   : > { %v1011_v51 = vpop.f32.mrf.mxu1 }
0x10ce   : > { %v1022_v52 = vadd.f32 %v1011_v51, %v1877_v7  ;;  %v1015_v53 = vadd.f32 %v1011_v51, %v942_v3 }
0x10cf   : > { %v1647_v2 = vpop.f32.mrf.mxu1 }
0x10d0   : > { %1024 = vrot.lane.b32.xlu1 %v1022_v52, %s1773_s27  ;;  %v1530_v54 = vmul.f32 -1.442695, %v1015_v53 }
0x10d2   : > { %1729 = vpow2.f32 %v1530_v54 }
0x10df   : > { %v1730_v4 = vpop.eup %1729 }
0x10e0   : > { %v1019_v55 = vadd.f32 1.0, %v1730_v4 }
0x10e2   : > { %1731 = vrcp.f32 %v1019_v55 }
0x10ef   : > { %v1732_v0 = vpop.eup %1731 }
0x1142   : > { %v1025_v5 = vpop.permute.xlu1 %1024 }
0x1143   : > { %v1027_v56 = vmul.f32 %v1732_v0, %v1025_v5 }
0x1145   : > { %1029 = vrot.lane.b32.xlu0 %v1027_v56, %s1773_s27 }
0x11b7   : > { %v1030_v57 = vpop.permute.xlu0 %1029 }
0x11b8   : > { %v1032_v58 = vadd.f32 %v1030_v57, %v942_v3 }
0x11ba   : > { %1733 = vtanh.f32 %v1032_v58 }
0x11c7   : > { %v1734_v59 = vpop.eup %1733 }
0x11c8   : > { %v1034_v60 = vsub.f32 %v930_v49, %v1734_v59 }
0x11ca   : > { %1036 = vrot.lane.b32.xlu1 %v1034_v60, %s1775_s23 }
0x123c   : > { %v1037_v61 = vpop.permute.xlu1 %1036 }
0x123d   : > { %v1039_v62 = vmul.f32 %v1732_v0, %v1037_v61 }
0x123f   : > { %1041 = vrot.lane.b32.xlu0 %v1039_v62, %s1774_s8 }
0x12b1   : > { %v1042_v63 = vpop.permute.xlu0 %1041 }
0x12b2   : > { %v1044_v1 = vadd.f32 %v1734_v59, %v1042_v63 }
0x12b4   : > { %1046 = vrot.lane.b32.xlu1 %v1044_v1, %s1773_s27 }
0x1326   : > { %v1047_v6 = vpop.permute.xlu1 %1046 }
0x1327   : > { %1050 = vst.msk [vmem:[%s1049_s10] sm:$0x3] %vm346_vm0, %v1047_v6  ;;  %1657 = vmatmul.mubr.msk.f32.vlgmr.msra.gmra.mxu0 %vm363_vm2, %v1047_v6 }
0x13e7   : > { %v1124_v8 = vpop.f32.mrf.mxu0 }
0x13e8   : > { %v1135_v9 = vadd.f32 %v1124_v8, %v1877_v7  ;;  %v1128_v12 = vadd.f32 %v1124_v8, %v1055_v11 }
0x13e9   : > { %v1658_v10 = vpop.f32.mrf.mxu0 }
0x13ea   : > { %1137 = vrot.lane.b32.xlu0 %v1135_v9, %s1773_s27  ;;  %v1533_v13 = vmul.f32 -1.442695, %v1128_v12 }
0x13ec   : > { %1735 = vpow2.f32 %v1533_v13 }
0x13f9   : > { %v1736_v14 = vpop.eup %1735 }
0x13fa   : > { %v1132_v15 = vadd.f32 1.0, %v1736_v14 }
0x13fc   : > { %1737 = vrcp.f32 %v1132_v15 }
0x1409   : > { %v1738_v16 = vpop.eup %1737 }
0x145c   : > { %v1138_v17 = vpop.permute.xlu0 %1137 }
0x145d   : > { %v1140_v18 = vmul.f32 %v1738_v16, %v1138_v17 }
0x145f   : > { %1142 = vrot.lane.b32.xlu1 %v1140_v18, %s1773_s27 }
0x14d1   : > { %v1143_v19 = vpop.permute.xlu1 %1142 }
0x14d2   : > { %v1145_v20 = vadd.f32 %v1143_v19, %v1055_v11 }
0x14d4   : > { %1739 = vtanh.f32 %v1145_v20 }
0x14e1   : > { %v1740_v21 = vpop.eup %1739 }
0x14e2   : > { %v1147_v22 = vsub.f32 %v1044_v1, %v1740_v21 }
0x14e4   : > { %1149 = vrot.lane.b32.xlu0 %v1147_v22, %s1775_s23 }
0x1556   : > { %v1150_v23 = vpop.permute.xlu0 %1149 }
0x1557   : > { %v1152_v24 = vmul.f32 %v1738_v16, %v1150_v23 }
0x1559   : > { %1154 = vrot.lane.b32.xlu1 %v1152_v24, %s1774_s8 }
0x15cb   : > { %v1155_v25 = vpop.permute.xlu1 %1154 }
0x15cc   : > { %v1157_v26 = vadd.f32 %v1740_v21, %v1155_v25 }
0x15ce   : > { %1159 = vrot.lane.b32.xlu0 %v1157_v26, %s1773_s27 }
0x1640   : > { %v1160_v27 = vpop.permute.xlu0 %1159 }
0x1641   : > { %1163 = vst.msk [vmem:[%s1162_s15] sm:$0x3] %vm346_vm0, %v1160_v27  ;;  %1668 = vmatmul.mubr.msk.f32.vlgmr.msra.gmra.mxu1 %vm363_vm2, %v1160_v27 }
0x1701   : > { %v1236_v28 = vpop.f32.mrf.mxu1 }
0x1702   : > { %v1247_v29 = vadd.f32 %v1236_v28, %v1877_v7  ;;  %v1240_v32 = vadd.f32 %v1236_v28, %v1167_v31 }
0x1703   : > { %v1669_v30 = vpop.f32.mrf.mxu1 }
0x1704   : > { %1249 = vrot.lane.b32.xlu1 %v1247_v29, %s1773_s27  ;;  %v1536_v33 = vmul.f32 -1.442695, %v1240_v32 }
0x1706   : > { %1741 = vpow2.f32 %v1536_v33 }
0x1713   : > { %v1742_v34 = vpop.eup %1741 }
0x1714   : > { %v1244_v35 = vadd.f32 1.0, %v1742_v34 }
0x1716   : > { %1743 = vrcp.f32 %v1244_v35 }
0x1723   : > { %v1744_v36 = vpop.eup %1743 }
0x1776   : > { %v1250_v37 = vpop.permute.xlu1 %1249 }
0x1777   : > { %v1252_v38 = vmul.f32 %v1744_v36, %v1250_v37 }
0x1779   : > { %1254 = vrot.lane.b32.xlu0 %v1252_v38, %s1773_s27 }
0x17eb   : > { %v1255_v7 = vpop.permute.xlu0 %1254 }
0x17ec   : > { %v1257_v39 = vadd.f32 %v1255_v7, %v1167_v31 }
0x17ee   : > { %1745 = vtanh.f32 %v1257_v39 }
0x17fb   : > { %v1746_v40 = vpop.eup %1745 }
0x17fc   : > { %v1259_v41 = vsub.f32 %v1157_v26, %v1746_v40 }
0x17fe   : > { %1261 = vrot.lane.b32.xlu1 %v1259_v41, %s1775_s23 }
0x1870   : > { %v1262_v42 = vpop.permute.xlu1 %1261 }
0x1871   : > { %v1264_v43 = vmul.f32 %v1744_v36, %v1262_v42 }
0x1873   : > { %1266 = vrot.lane.b32.xlu0 %v1264_v43, %s1774_s8 }
0x18e5   : > { %v1267_v44 = vpop.permute.xlu0 %1266 }
0x18e6   : > { %v1269_v45 = vadd.f32 %v1746_v40, %v1267_v44 }
0x18e8   : > { %1271 = vrot.lane.b32.xlu1 %v1269_v45, %s1773_s27 }
0x195a   : > { %v1272_v46 = vpop.permute.xlu1 %1271 }
0x195b   : > { %1275 = vst.msk [vmem:[%s1274_s14] sm:$0x3] %vm346_vm0, %v1272_v46  ;;  %1276 = vst.msk [vmem:[#allocation2] sm:$0x3] %vm346_vm0, %v1272_v46 }
0x195c   : > { %1277 = vst.msk [vmem:[%s341_s28] sm:$0x3] %vm346_vm0, %v1272_v46 }
0x195d PF: > { %s15_s17 = sadd.s32 1, %s1769_s17   ;;  %s2063_s15 = smov %s1765_s16 }
0x195e   : > { %p12_p5 = scmp.ge.s32.totalorder %s15_s17, 4   ;;  %s2064_s16 = smov %s2066_s18 }
0x1960   :  { %14 = sbr.rel (!%p12_p5) target bundleno = 2 (0x2), region = 100 }

// kernel: encoder_gru_forward.13
= control target key start
LH: loop header
LB: loop body
LE: loop exit
PB: predicated region body
PF: predicated region fallthrough
CT: control target
= control target key end

     0   :  { %vm30_vm0 = vcmask 523264   ;;  %s272_s0 = inlined_call_operand.vmem [shape: f32[16,64], index: 0, kind: input, shape index: {}]   ;;  %s273_s1 = inlined_call_operand.vmem [shape: f32[64,64], index: 1, kind: input, shape index: {}]   ;;  %s274_s2 = inlined_call_operand.vmem [shape: f32[1,64], index: 2, kind: input, shape index: {}]   ;;  %s275_s3 = inlined_call_operand.vmem [shape: f32[16,64], index: 3, kind: input, shape index: {}]   ;;  %s276_s4 = inlined_call_operand.hbm [shape: f32[16,64], index: 4, kind: output, shape index: {}]  }
   0x1   :  { %v29_v0 = vld [vmem:[%s273_s1 + $0x38] sm:$0xff]  ;;  %v28_v1 = vld [vmem:[%s273_s1 + $0x30] sm:$0xff]  ;;  %v27_v2 = vld [vmem:[%s273_s1 + $0x28] sm:$0xff] }
   0x2   :  { %154 = vmatprep.subr.mxu0 %v29_v0  ;;  %v20_v3 = vld [vmem:[%s272_s0] sm:$0xff] }
   0x3   :  { %155 = vmatpush3.msra.mxu0 %v29_v0  ;;  %170 = vmatprep.mubr.msk.f32.mxu0 %vm30_vm0, %v20_v3 }
   0x4   :  { %156 = vmatprep.subr.mxu0 %v28_v1 }
   0x5   :  { %9 = vsyncpa [#allocation3], 0  ;;  %157 = vmatpush3.msra.mxu0 %v28_v1  ;;  %v26_v4 = vld [vmem:[%s273_s1 + $0x20] sm:$0xff]  ;;  %v25_v5 = vld [vmem:[%s273_s1 + $0x18] sm:$0xff]  ;;  %s198_s14 = smov [#allocation2]  }
   0x6   :  { %158 = vmatprep.subr.mxu0 %v27_v2  ;;  %v24_v6 = vld [vmem:[%s273_s1 + $0x10] sm:$0xff]  ;;  %v23_v7 = vld [vmem:[%s273_s1 + $0x8] sm:$0xff]  ;;  %v22_v8 = vld [vmem:[%s273_s1] sm:$0xff] }
   0x7   :  { %159 = vmatpush3.msra.mxu0 %v27_v2  ;;  %v21_v9 = vld [vmem:[%s272_s0 + $0x8] sm:$0xff]  ;;  %v143_v12 = vld [vmem:[%s274_s2] ss:$0 sm:$0xff]  ;;  %s130_s0 = sshll.u32 %s198_s14, 4  ;;  %s131_s0 = int_to_ptr.vmem [resolvable:$true] %s130_s0 }
   0x8   :  { %160 = vmatprep.subr.mxu0 %v26_v4  ;;  %v19_v10 = vld [vmem:[%s275_s3 + $0x8] sm:$0xff]  ;;  %v18_v13 = vld [vmem:[%s275_s3] sm:$0xff]  ;;  %s176_s15 = scalar_lea.vmem %s131_s0, 256  ;;  %p181_p1 = scmp.lt.s32.totalorder %s131_s0, %s131_s0 }
   0x9   :  { %161 = vmatpush3.msra.mxu0 %v26_v4  ;;  %p177_p0 = scmp.ne.s32.totalorder %s131_s0, %s176_s15  ;;  %p182_p2 = scmp.lt.s32.totalorder %s176_s15, %s176_s15 }
   0xa   :  { %162 = vmatprep.subr.mxu0 %v25_v5 }
   0xb   :  { %163 = vmatpush3.msra.mxu0 %v25_v5  ;;  %p183_p3 = por %p182_p2, %p181_p1 }
   0xc   :  { %164 = vmatprep.subr.mxu0 %v24_v6 }
   0xd   :  { %165 = vmatpush3.msra.mxu0 %v24_v6  ;;  %p184_p4 = pnand %p183_p3, %p177_p0 }
   0xe   :  { %166 = vmatprep.subr.mxu0 %v23_v7 }
   0xf   :  { %167 = vmatpush3.msra.mxu0 %v23_v7 }
  0x10   :  { %168 = vmatprep.subr.mxu0 %v22_v8 }
  0x11   :  { %169 = vmatpush3.msra.mxu0 %v22_v8 }
  0x12   :  { %171 = vmatmul.mubr.msk.f32.vlgmr.msra.gmra.mxu0 %vm30_vm0, %v21_v9 }
  0xd2   :  { %v172_v11 = vpop.f32.mrf.mxu0 }
  0xd3   :  { %v113_v14 = vadd.f32 %v172_v11, %v19_v10 }
  0xd4   :  { %v103_v15 = vpop.f32.mrf.mxu0 }
  0xd5   :  { %v122_v16 = vadd.f32 %v143_v12, %v113_v14  ;;  %v112_v17 = vadd.f32 %v103_v15, %v18_v13 }
  0xd7   :  { %124 = vst.msk [vmem:[#allocation2 + $0x8] sm:$0xff] %vm30_vm0, %v122_v16  ;;  %v121_v18 = vadd.f32 %v143_v12, %v112_v17 }
  0xd9   :  { %123 = vst.msk [vmem:[#allocation2] sm:$0xff] %vm30_vm0, %v121_v18 }
  0xda   :  { %187 = shalt.err (!%p184_p4)
}
  0xdb   :  { %s199_s2 = smov 128   ;;  %s200_s3 = smov 8  }
  0xdc   :  { %136 = dma.vmem_to_hbm [thread:$0]  %s131_s0, 256, %s276_s4, [#allocation3], %s199_s2, %s199_s2, %s200_s3  }
  0xdd   :  { %196 = dma.done.wait [#allocation3], 256  }
  0xde   :  { %197 = vsyncadd [#allocation3], 4294967040 }
  0xdf   :  { %140 = vsyncpa [#allocation3], 1 }

// kernel: encoder_gru_forward.12
= control target key start
LH: loop header
LB: loop body
LE: loop exit
PB: predicated region body
PF: predicated region fallthrough
CT: control target
= control target key end

     0   :  { %s1095_s12 = smov 0   ;;  %s1172_s0 = inlined_call_operand.vmem [shape: f32[2,4,8,16], index: 0, kind: input, shape index: {}]   ;;  %s1173_s1 = inlined_call_operand.vmem [shape: f32[2,4,8,16], index: 1, kind: input, shape index: {}]   ;;  %s1174_s2 = inlined_call_operand.vmem [shape: f32[2,4,8,16], index: 2, kind: input, shape index: {}]   ;;  %s1175_s3 = inlined_call_operand.vmem [shape: f32[2,4,8,16], index: 3, kind: output, shape index: {}]  }
   0x1 LB: > { %s952_s13 = sadd.s32 4294967295, %s1071_s12   ;;  %p956_p0 = scmp.ge.s32.totalorder %s1071_s12, 1  ;;  %s1071_s12 = sphi %s1095_s12, %s13_s12  }
   0x2   : > { %p157_p1 = scmp.lt.s32.totalorder %s1071_s12, 3 }
   0x4   : > { %p158_p2 = pnand %p956_p0, %p157_p1 }
   0x5   : > { %p191_p3 = scmp.lt.s32.totalorder (!%p158_p2), %s952_s13, 1 }
   0x6   : > { %161 = sbr.rel (%p158_p2) target bundleno = 728 (0x2d8), region = 32 }
   0xb   : > { %v1073_v0 = vmov 0.0   ;;  %vm1074_vm0 = vmmov 0   ;;  %s1177_s13 = smov (!%p191_p3, %s952_s13), 1  ;;  %vm223_vm1 = vcmask 130048   ;;  %vm532_vm2 = vcmask 64512  }
   0xc   : > { %999 = vmatprep.subr.mxu0 %v1073_v0  ;;  %1001 = vmatprep.mubr.msk.f32.mxu0 %vm1074_vm0, %v1073_v0  ;;  %s1109_s14 = sshll.u32 %s1177_s13, 5 }
   0xd   : > { %1004 = vmatprep.subr.mxu1 %v1073_v0  ;;  %1006 = vmatprep.mubr.msk.f32.mxu1 %vm1074_vm0, %v1073_v0  ;;  %s200_s17 = scalar_lea.vmem %s1173_s1, %s1109_s14  ;;  %s195_s20 = scalar_lea.vmem %s1172_s0, %s1109_s14 }
   0xe   : > { %v215_v1 = vld [vmem:[%s200_s17] sm:$0xff]  ;;  %v216_v2 = vld [vmem:[%s200_s17 + $0x8] sm:$0xff]  ;;  %v217_v5 = vld [vmem:[%s200_s17 + $0x10] sm:$0xff]  ;;  %s205_s23 = scalar_lea.vmem %s1174_s2, %s1109_s14  ;;  %s210_s26 = scalar_lea.vmem %s1175_s3, %s1109_s14 }
   0xf   : > { %1000 = vmatpush3.xpose.msk.msra.mxu0 %vm223_vm1, %v215_v1  ;;  %v211_v3 = vld [vmem:[%s195_s20] sm:$0xff]  ;;  %1005 = vmatpush3.xpose.msk.msra.mxu1 %vm223_vm1, %v216_v2  ;;  %v212_v4 = vld [vmem:[%s195_s20 + $0x8] sm:$0xff]  ;;  %v218_v6 = vld [vmem:[%s200_s17 + $0x18] sm:$0xff] }
  0x10   : > { %1009 = vmatprep.subr.mxu0 %v1073_v0  ;;  %1014 = vmatprep.subr.mxu1 %v1073_v0  ;;  %v213_v7 = vld [vmem:[%s195_s20 + $0x10] sm:$0xff]  ;;  %v214_v8 = vld [vmem:[%s195_s20 + $0x18] sm:$0xff]  ;;  %v219_v45 = vld [vmem:[%s205_s23] sm:$0xff] }
  0x11   : > { %v220_v46 = vld [vmem:[%s205_s23 + $0x8] sm:$0xff]  ;;  %v221_v53 = vld [vmem:[%s205_s23 + $0x10] sm:$0xff]  ;;  %v222_v57 = vld [vmem:[%s205_s23 + $0x18] sm:$0xff] }
  0x12   : > { %1002 = vmatmul.mubr.msk.f32.vlgmr.msra.gmra.mxu0 %vm223_vm1, %v211_v3  ;;  %1007 = vmatmul.mubr.msk.f32.vlgmr.msra.gmra.mxu1 %vm223_vm1, %v212_v4 }
  0x13   : > { %1010 = vmatpush3.xpose.msk.msra.mxu0 %vm223_vm1, %v217_v5  ;;  %1011 = vmatprep.mubr.msk.f32.mxu0 %vm1074_vm0, %v1073_v0 }
  0x14   : > { %1015 = vmatpush3.xpose.msk.msra.mxu1 %vm223_vm1, %v218_v6  ;;  %1016 = vmatprep.mubr.msk.f32.mxu1 %vm1074_vm0, %v1073_v0 }
  0x15   : > { %1019 = vmatprep.subr.mxu0 %v1073_v0  ;;  %1024 = vmatprep.subr.mxu1 %v1073_v0 }
  0x16   : > { %1012 = vmatmul.mubr.msk.f32.vlgmr.msra.gmra.mxu0 %vm223_vm1, %v213_v7 }
  0x17   : > { %1017 = vmatmul.mubr.msk.f32.vlgmr.msra.gmra.mxu1 %vm223_vm1, %v214_v8  ;;  %1021 = vmatprep.mubr.msk.f32.mxu0 %vm1074_vm0, %v1073_v0 }
  0x18   : > { %1026 = vmatprep.mubr.msk.f32.mxu1 %vm1074_vm0, %v1073_v0  ;;  %1020 = vmatpush3.msra.mxu0 %v219_v45 }
  0x19   : > { %1029 = vmatprep.subr.mxu0 %v1073_v0  ;;  %1025 = vmatpush3.msra.mxu1 %v220_v46 }
  0x1a   : > { %1034 = vmatprep.subr.mxu1 %v1073_v0 }
  0xd2   : > { %v296_v9 = vpop.f32.mrf.mxu0  ;;  %v372_v10 = vpop.f32.mrf.mxu1 }
  0xd3   : > { %v528_v11 = vmul.f32 0.25, %v296_v9  ;;  %v529_v12 = vmul.f32 0.25, %v372_v10 }
  0xd4   : > { %v1003_v13 = vpop.f32.mrf.mxu0  ;;  %v1008_v14 = vpop.f32.mrf.mxu1 }
  0xd5   : > { %v533_v15 = vsel %vm532_vm2, %v528_v11, -inf  ;;  %v536_v19 = vsel %vm532_vm2, %v529_v12, -inf }
  0xd6   : > { %534 = vmax.xlane.f32.xlu0 %v533_v15  ;;  %v448_v16 = vpop.f32.mrf.mxu0 }
  0xd7   : > { %v530_v17 = vmul.f32 0.25, %v448_v16  ;;  %v524_v18 = vpop.f32.mrf.mxu1 }
  0xd8   : > { %v1013_v20 = vpop.f32.mrf.mxu0  ;;  %v531_v21 = vmul.f32 0.25, %v524_v18 }
  0xd9   : > { %v539_v22 = vsel %vm532_vm2, %v530_v17, -inf  ;;  %v1018_v23 = vpop.f32.mrf.mxu1 }
  0xda   : > { %537 = vmax.xlane.f32.xlu0 %v536_v19  ;;  %540 = vmax.xlane.f32.xlu1 %v539_v22  ;;  %v542_v24 = vsel %vm532_vm2, %v531_v21, -inf }
  0xde   : > { %543 = vmax.xlane.f32.xlu1 %v542_v24 }
 0x15f   : > { %v535_v25 = vpop.xlane.xlu0 %534 }
 0x160   : > { %v545_v26 = vsub.f32 %v528_v11, %v535_v25 }
 0x162   : > { %v549_v27 = vmul.f32 1.442695, %v545_v26 }
 0x163   : > { %v538_v28 = vpop.xlane.xlu0 %537  ;;  %v541_v29 = vpop.xlane.xlu1 %540 }
 0x164   : > { %1049 = vpow2.f32 %v549_v27  ;;  %v546_v30 = vsub.f32 %v529_v12, %v538_v28  ;;  %v547_v31 = vsub.f32 %v530_v17, %v541_v29 }
 0x166   : > { %v551_v32 = vmul.f32 1.442695, %v546_v30  ;;  %v553_v33 = vmul.f32 1.442695, %v547_v31 }
 0x167   : > { %v544_v34 = vpop.xlane.xlu1 %543 }
 0x168   : > { %1051 = vpow2.f32 %v551_v32  ;;  %v548_v35 = vsub.f32 %v531_v21, %v544_v34 }
 0x169   : > { %1053 = vpow2.f32 %v553_v33 }
 0x16a   : > { %v555_v36 = vmul.f32 1.442695, %v548_v35 }
 0x16c   : > { %1055 = vpow2.f32 %v555_v36 }
 0x171   : > { %v1050_v37 = vpop.eup %1049 }
 0x172   : > { %v557_v38 = vsel %vm532_vm2, %v1050_v37, 0.0 }
 0x173   : > { %558 = vadd.xlane.f32.xlu0 %v557_v38 }
 0x175   : > { %v1052_v39 = vpop.eup %1051 }
 0x176   : > { %v1054_v40 = vpop.eup %1053  ;;  %v560_v41 = vsel %vm532_vm2, %v1052_v39, 0.0 }
 0x177   : > { %561 = vadd.xlane.f32.xlu1 %v560_v41  ;;  %v563_v42 = vsel %vm532_vm2, %v1054_v40, 0.0 }
 0x178   : > { %564 = vadd.xlane.f32.xlu0 %v563_v42 }
 0x179   : > { %v1056_v43 = vpop.eup %1055 }
 0x17a   : > { %v566_v44 = vsel %vm532_vm2, %v1056_v43, 0.0 }
 0x17b   : > { %567 = vadd.xlane.f32.xlu1 %v566_v44 }
 0x1fc   : > { %v559_v47 = vpop.xlane.xlu0 %558 }
 0x1fd   : > { %1057 = vrcp.f32 %v559_v47 }
 0x200   : > { %v562_v48 = vpop.xlane.xlu1 %561 }
 0x201   : > { %v565_v49 = vpop.xlane.xlu0 %564  ;;  %1059 = vrcp.f32 %v562_v48 }
 0x202   : > { %1061 = vrcp.f32 %v565_v49 }
 0x204   : > { %v568_v50 = vpop.xlane.xlu1 %567 }
 0x205   : > { %1063 = vrcp.f32 %v568_v50 }
 0x20a   : > { %v1058_v51 = vpop.eup %1057 }
 0x20b   : > { %v573_v52 = vmul.f32 %v1058_v51, %v1050_v37 }
 0x20d   : > { %1022 = vmatmul.mubr.msk.f32.vlgmr.msra.gmra.mxu0 %vm532_vm2, %v573_v52 }
 0x20e   : > { %v1060_v54 = vpop.eup %1059  ;;  %1030 = vmatpush3.msra.mxu0 %v221_v53  ;;  %1031 = vmatprep.mubr.msk.f32.mxu0 %vm1074_vm0, %v1073_v0 }
 0x20f   : > { %v1062_v55 = vpop.eup %1061  ;;  %v574_v56 = vmul.f32 %v1060_v54, %v1052_v39 }
 0x210   : > { %v575_v58 = vmul.f32 %v1062_v55, %v1054_v40 }
 0x211   : > { %1027 = vmatmul.mubr.msk.f32.vlgmr.msra.gmra.mxu1 %vm532_vm2, %v574_v56 }
 0x212   : > { %v1064_v59 = vpop.eup %1063  ;;  %1032 = vmatmul.mubr.msk.f32.vlgmr.msra.gmra.mxu0 %vm532_vm2, %v575_v58  ;;  %1035 = vmatpush3.msra.mxu1 %v222_v57 }
 0x213   : > { %1036 = vmatprep.mubr.msk.f32.mxu1 %vm1074_vm0, %v1073_v0  ;;  %v576_v60 = vmul.f32 %v1064_v59, %v1056_v43 }
 0x215   : > { %1037 = vmatmul.mubr.msk.f32.vlgmr.msra.gmra.mxu1 %vm532_vm2, %v576_v60 }
 0x2cd   : > { %v646_v61 = vpop.f32.mrf.mxu0 }
 0x2ce   : > { %869 = vst.msk [vmem:[%s210_s26] sm:$0xff] %vm223_vm1, %v646_v61 }
 0x2cf   : > { %v1023_v62 = vpop.f32.mrf.mxu0 }
 0x2d1   : > { %v719_v63 = vpop.f32.mrf.mxu1 }
 0x2d2   : > { %870 = vst.msk [vmem:[%s210_s26 + $0x8] sm:$0xff] %vm223_vm1, %v719_v63  ;;  %v792_v1 = vpop.f32.mrf.mxu0 }
 0x2d3   : > { %871 = vst.msk [vmem:[%s210_s26 + $0x10] sm:$0xff] %vm223_vm1, %v792_v1  ;;  %v1028_v2 = vpop.f32.mrf.mxu1 }
 0x2d4   : > { %v1033_v3 = vpop.f32.mrf.mxu0 }
 0x2d5   : > { %v865_v0 = vpop.f32.mrf.mxu1 }
 0x2d6   : > { %872 = vst.msk [vmem:[%s210_s26 + $0x18] sm:$0xff] %vm223_vm1, %v865_v0 }
 0x2d7   : > { %v1038_v4 = vpop.f32.mrf.mxu1 }
 0x2d8 PF: > { %s13_s12 = sadd.s32 1, %s1071_s12  }
 0x2d9   : > { %p10_p4 = scmp.ge.s32.totalorder %s13_s12, 4  }
 0x2db   :  { %12 = sbr.rel (!%p10_p4) target bundleno = 1 (0x1), region = 68 }

</bundles_post_ra>
